<compile_context>
chip_gen: v6e
topology: v6e:2x2x1
jax: 0.10.0
libtpu: 0.0.40
codegen_flags: <defaults>
</compile_context>

<pallas_src>
import functools

import jax
import jax.numpy as jnp
from jax import lax
from jax.experimental import pallas as pl
from jax.experimental.pallas import tpu as pltpu


# -----------------------------------------------------------------------------
# In-kernel helpers (pure functions on VMEM-resident values)
# -----------------------------------------------------------------------------
def _dw3x3(pad_ref, x, w, b, stride):
    """Depthwise 3x3 conv, padding=1, stride 1 or 2, + bias (BN scale folded).

    x: (h, w, c) f32 value.  pad_ref: (h+2, w+2, c) f32 VMEM scratch used for
    zero padding and (stride=2) as staging for the strided subsample.
    """
    h, wd, c = x.shape
    # Zero-pad entirely in VMEM (no HBM round trip).
    pad_ref[...] = jnp.zeros_like(pad_ref)
    pad_ref[1:h + 1, 1:wd + 1, :] = x
    xp = pad_ref[...]                              # (h+2, w+2, c)
    acc = jnp.zeros((h, wd, c), jnp.float32)
    for kh in range(3):                            # fully unrolled 3x3 taps
        for kw in range(3):
            acc = acc + xp[kh:kh + h, kw:kw + wd, :] * w[kh, kw, :]
    y = acc + b
    if stride == 1:
        return y
    # stride == 2: stride-2 output == stride-1 output at even positions
    # (k=3, p=1).  Subsample in VMEM: even rows via a leading-dim split,
    # even cols via a sublane-strided load from the staging scratch.
    ho, wo = h // 2, wd // 2
    y = y.reshape(ho, 2, wd, c)[:, 0, :, :]        # even rows
    pad_ref[0:ho, 0:wd, :] = y                     # stage in VMEM
    return pad_ref[pl.ds(0, ho), pl.ds(0, wo, 2), :]   # even cols


def _pw(x, w, b, relu=True):
    """1x1 conv (+ folded BN bias, + ReLU) as a channel matmul."""
    h, wd, cin = x.shape
    cout = w.shape[1]
    y = jnp.dot(x.reshape(h * wd, cin), w, preferred_element_type=jnp.float32)
    y = y + b
    if relu:
        y = jnp.maximum(y, 0.0)
    return y.reshape(h, wd, cout)


# -----------------------------------------------------------------------------
# Fused choice-block kernels (one grid step = one batch element)
# -----------------------------------------------------------------------------
def _choice_block_kernel_s1(x_ref, dw1_w, b1, pw1_w, b2, dw2_w, b3, pw2_w, b4,
                            dw3_w, b5, pw3_w, b6, o_ref, pad_a, pad_b, *, in_c):
    x = x_ref[0].astype(jnp.float32)               # (H, W, 2*in_c)
    x1 = x[:, :, :in_c]                            # untouched split half
    x2 = x[:, :, in_c:]
    x2 = _dw3x3(pad_a, x2, dw1_w[...].astype(jnp.float32), b1[0], stride=1)
    x2 = _pw(x2, pw1_w[...].astype(jnp.float32), b2[0])
    x2 = _dw3x3(pad_b, x2, dw2_w[...].astype(jnp.float32), b3[0], stride=1)
    x2 = _pw(x2, pw2_w[...].astype(jnp.float32), b4[0])
    x2 = _dw3x3(pad_b, x2, dw3_w[...].astype(jnp.float32), b5[0], stride=1)
    x2 = _pw(x2, pw3_w[...].astype(jnp.float32), b6[0])
    o_ref[0] = jnp.concatenate([x1, x2], axis=-1).astype(o_ref.dtype)


def _choice_block_kernel_s2(x_ref, dw1_w, b1, pw1_w, b2, dw2_w, b3, pw2_w, b4,
                            dw3_w, b5, pw3_w, b6, dw4_w, b7, pw4_w, b8,
                            o_ref, pad_a, pad_b):
    x = x_ref[0].astype(jnp.float32)               # (H, W, in_c)
    # Shortcut branch: DW_conv4 (stride 2) -> conv4 -> ReLU
    x1 = _dw3x3(pad_a, x, dw4_w[...].astype(jnp.float32), b7[0], stride=2)
    x1 = _pw(x1, pw4_w[...].astype(jnp.float32), b8[0])
    # Main branch
    x2 = _dw3x3(pad_a, x, dw1_w[...].astype(jnp.float32), b1[0], stride=2)
    x2 = _pw(x2, pw1_w[...].astype(jnp.float32), b2[0])
    x2 = _dw3x3(pad_b, x2, dw2_w[...].astype(jnp.float32), b3[0], stride=1)
    x2 = _pw(x2, pw2_w[...].astype(jnp.float32), b4[0])
    x2 = _dw3x3(pad_b, x2, dw3_w[...].astype(jnp.float32), b5[0], stride=1)
    x2 = _pw(x2, pw3_w[...].astype(jnp.float32), b6[0])
    o_ref[0] = jnp.concatenate([x1, x2], axis=-1).astype(o_ref.dtype)


# -----------------------------------------------------------------------------
# BN folding + wrapper
# -----------------------------------------------------------------------------
def _fold_dw(w, bn):
    scale, bias = bn
    return w * scale[None, None, :], bias.reshape(1, -1)


def _fold_pw(w, bn):
    scale, bias = bn
    return w * scale[None, :], bias.reshape(1, -1)


def _const_spec(shape):
    return pl.BlockSpec(shape, lambda n: (0,) * len(shape))


def choice_block_x_forward(x_nchw, params, in_c, stride):
    """Choice_Block_x forward.  NCHW in / NCHW out; kernel runs in NHWC."""
    N, c_in_tot, H, W = x_nchw.shape
    if stride == 1:
        assert c_in_tot == 2 * in_c
    x = jnp.transpose(x_nchw, (0, 2, 3, 1))        # NCHW -> NHWC
    Ho, Wo = H // stride, W // stride
    mid_c = params["conv1_w"].shape[1]
    out_c = params["conv3_w"].shape[1]
    ct = (in_c if stride == 1 else out_c) + out_c
    assert ct % 2 == 0

    # Fold BN scales into the conv weights (kernel only adds bias + ReLU).
    dw1_w, b1 = _fold_dw(params["dw1_w"], params["bn1"])
    pw1_w, b2 = _fold_pw(params["conv1_w"], params["bn2"])
    dw2_w, b3 = _fold_dw(params["dw2_w"], params["bn3"])
    pw2_w, b4 = _fold_pw(params["conv2_w"], params["bn4"])
    dw3_w, b5 = _fold_dw(params["dw3_w"], params["bn5"])
    pw3_w, b6 = _fold_pw(params["conv3_w"], params["bn6"])
    ops = [dw1_w, b1, pw1_w, b2, dw2_w, b3, pw2_w, b4, dw3_w, b5, pw3_w, b6]
    if stride == 2:
        dw4_w, b7 = _fold_dw(params["dw4_w"], params["bn7"])
        pw4_w, b8 = _fold_pw(params["conv4_w"], params["bn8"])
        ops += [dw4_w, b7, pw4_w, b8]
        kernel = _choice_block_kernel_s2
    else:
        kernel = functools.partial(_choice_block_kernel_s1, in_c=in_c)

    in_specs = [pl.BlockSpec((1, H, W, c_in_tot), lambda n: (n, 0, 0, 0))]
    in_specs += [_const_spec(o.shape) for o in ops]

    out = pl.pallas_call(
        kernel,
        out_shape=jax.ShapeDtypeStruct((N, Ho, Wo, ct), x.dtype),
        grid=(N,),
        in_specs=in_specs,
        out_specs=pl.BlockSpec((1, Ho, Wo, ct), lambda n: (n, 0, 0, 0)),
        scratch_shapes=[
            pltpu.VMEM((H + 2, W + 2, in_c), jnp.float32),       # dw1 / dw4 pad
            pltpu.VMEM((Ho + 2, Wo + 2, mid_c), jnp.float32),    # dw2 / dw3 pad
        ],
        compiler_params=pltpu.CompilerParams(
            dimension_semantics=("parallel",)),
    )(x, *ops)

    # Channel shuffle (groups=2) + NHWC -> NCHW: one fused XLA layout pass.
    out = out.reshape(N, Ho, Wo, 2, ct // 2).swapaxes(-1, -2).reshape(N, Ho, Wo, ct)
    return jnp.transpose(out, (0, 3, 1, 2))


# -----------------------------------------------------------------------------
# Parameter construction (deterministic, synthetic)
# -----------------------------------------------------------------------------
def _bn_fold(key, c, eps=1e-5):
    k1, k2, k3, k4 = jax.random.split(key, 4)
    gamma = 1.0 + 0.1 * jax.random.normal(k1, (c,), jnp.float32)
    beta = 0.1 * jax.random.normal(k2, (c,), jnp.float32)
    mean = 0.1 * jax.random.normal(k3, (c,), jnp.float32)
    var = 1.0 + 0.1 * jax.random.uniform(k4, (c,), jnp.float32)
    scale = gamma / jnp.sqrt(var + eps)
    return scale, beta - mean * scale


def init_params(key, in_c, mid_c, out_c, stride):
    ks = jax.random.split(key, 16)
    p = {}
    p["dw1_w"] = 0.2 * jax.random.normal(ks[0], (3, 3, in_c), jnp.float32)
    p["bn1"] = _bn_fold(ks[1], in_c)
    p["conv1_w"] = 0.2 * jax.random.normal(ks[2], (in_c, mid_c), jnp.float32)
    p["bn2"] = _bn_fold(ks[3], mid_c)
    p["dw2_w"] = 0.2 * jax.random.normal(ks[4], (3, 3, mid_c), jnp.float32)
    p["bn3"] = _bn_fold(ks[5], mid_c)
    p["conv2_w"] = 0.2 * jax.random.normal(ks[6], (mid_c, mid_c), jnp.float32)
    p["bn4"] = _bn_fold(ks[7], mid_c)
    p["dw3_w"] = 0.2 * jax.random.normal(ks[8], (3, 3, mid_c), jnp.float32)
    p["bn5"] = _bn_fold(ks[9], mid_c)
    p["conv3_w"] = 0.2 * jax.random.normal(ks[10], (mid_c, out_c), jnp.float32)
    p["bn6"] = _bn_fold(ks[11], out_c)
    if stride == 2:
        p["dw4_w"] = 0.2 * jax.random.normal(ks[12], (3, 3, in_c), jnp.float32)
        p["bn7"] = _bn_fold(ks[13], in_c)
        p["conv4_w"] = 0.2 * jax.random.normal(ks[14], (in_c, out_c), jnp.float32)
        p["bn8"] = _bn_fold(ks[15], out_c)
    return p


# -----------------------------------------------------------------------------
# Pure-JAX NCHW reference (mirrors the PyTorch forward) for correctness check
# -----------------------------------------------------------------------------
def _ref_dw(x, w_hwc, scale, bias, stride):
    C = x.shape[1]
    w = jnp.transpose(w_hwc, (2, 0, 1))[:, None]   # (C,1,3,3) == PyTorch DW weight
    y = lax.conv_general_dilated(
        x, w, (stride, stride), ((1, 1), (1, 1)),
        feature_group_count=C,
        dimension_numbers=("NCHW", "OIHW", "NCHW"),
        precision=lax.Precision.HIGHEST)
    return y * scale[None, :, None, None] + bias[None, :, None, None]


def _ref_pw(x, w_io, scale, bias, relu):
    w = jnp.transpose(w_io)[:, :, None, None]      # (Cout,Cin,1,1)
    y = lax.conv_general_dilated(
        x, w, (1, 1), ((0, 0), (0, 0)),
        dimension_numbers=("NCHW", "OIHW", "NCHW"),
        precision=lax.Precision.HIGHEST)
    y = y * scale[None, :, None, None] + bias[None, :, None, None]
    return jnp.maximum(y, 0.0) if relu else y


def reference_forward(x, p, in_c, stride):
    if stride == 1:
        x1, x2 = x[:, :in_c], x[:, in_c:]
    else:
        x1 = _ref_dw(x, p["dw4_w"], *p["bn7"], stride=2)
        x1 = _ref_pw(x1, p["conv4_w"], *p["bn8"], relu=True)
        x2 = x
    x2 = _ref_dw(x2, p["dw1_w"], *p["bn1"], stride=stride)
    x2 = _ref_pw(x2, p["conv1_w"], *p["bn2"], relu=True)
    x2 = _ref_dw(x2, p["dw2_w"], *p["bn3"], stride=1)
    x2 = _ref_pw(x2, p["conv2_w"], *p["bn4"], relu=True)
    x2 = _ref_dw(x2, p["dw3_w"], *p["bn5"], stride=1)
    x2 = _ref_pw(x2, p["conv3_w"], *p["bn6"], relu=True)
    x3 = jnp.concatenate([x1, x2], axis=1)
    n, c, h, w = x3.shape
    x3 = x3.reshape(n, 2, c // 2, h, w).swapaxes(1, 2).reshape(n, c, h, w)
    return x3


if __name__ == "__main__":
    in_c, mid_c, out_c = 8, 16, 8
    key = jax.random.PRNGKey(0)
    kx1, kx2, kp1, kp2 = jax.random.split(key, 4)

    forward = jax.jit(choice_block_x_forward, static_argnums=(2, 3))

    # stride = 1 branch (channel split): NCHW input with 2*in_c channels
    x_s1 = jax.random.normal(kx1, (2, 2 * in_c, 8, 8), jnp.float32)
    p_s1 = init_params(kp1, in_c, mid_c, out_c, stride=1)
    y_s1 = jax.block_until_ready(forward(x_s1, p_s1, in_c, 1))
    y_s1_ref = reference_forward(x_s1, p_s1, in_c, 1)
    assert y_s1.shape == (2, in_c + out_c, 8, 8)
    assert jnp.allclose(y_s1, y_s1_ref, atol=1e-3, rtol=1e-3)

    # stride = 2 branch (downsampling): NCHW input with in_c channels
    x_s2 = jax.random.normal(kx2, (2, in_c, 16, 16), jnp.float32)
    p_s2 = init_params(kp2, in_c, mid_c, out_c, stride=2)
    y_s2 = jax.block_until_ready(forward(x_s2, p_s2, in_c, 2))
    y_s2_ref = reference_forward(x_s2, p_s2, in_c, 2)
    assert y_s2.shape == (2, 2 * out_c, 8, 8)
    assert jnp.allclose(y_s2, y_s2_ref, atol=1e-3, rtol=1e-3)

    print("KERNEL_OK")
</pallas_src>

<mosaic_0001>
module attributes {stable_mosaic.version = 11 : i64} {
  func.func @_choice_block_kernel_s1(%arg0: i32, %arg1: memref<1x8x8x16xf32, #tpu.memory_space<vmem>>, %arg2: memref<3x3x8xf32, #tpu.memory_space<vmem>>, %arg3: memref<1x8xf32, #tpu.memory_space<vmem>>, %arg4: memref<8x16xf32, #tpu.memory_space<vmem>>, %arg5: memref<1x16xf32, #tpu.memory_space<vmem>>, %arg6: memref<3x3x16xf32, #tpu.memory_space<vmem>>, %arg7: memref<1x16xf32, #tpu.memory_space<vmem>>, %arg8: memref<16x16xf32, #tpu.memory_space<vmem>>, %arg9: memref<1x16xf32, #tpu.memory_space<vmem>>, %arg10: memref<3x3x16xf32, #tpu.memory_space<vmem>>, %arg11: memref<1x16xf32, #tpu.memory_space<vmem>>, %arg12: memref<16x8xf32, #tpu.memory_space<vmem>>, %arg13: memref<1x8xf32, #tpu.memory_space<vmem>>, %arg14: memref<1x8x8x16xf32, #tpu.memory_space<vmem>>, %arg15: memref<10x10x8xf32, #tpu.memory_space<vmem>>, %arg16: memref<10x10x16xf32, #tpu.memory_space<vmem>>) attributes {dimension_semantics = [#tpu.dimension_semantics<parallel>], iteration_bounds = array<i64: 2>, scalar_prefetch = 0 : i64, scratch_operands = 2 : i64, tpu.core_type = #tpu.core_type<tc>, window_params = [{transform_indices = @transform_0, window_bounds = array<i64: 1, 8, 8, 16>}, {pipeline_mode = #tpu.pipeline_mode<synchronous>, transform_indices = @transform_1, window_bounds = array<i64: 3, 3, 8>}, {pipeline_mode = #tpu.pipeline_mode<synchronous>, transform_indices = @transform_2, window_bounds = array<i64: 1, 8>}, {pipeline_mode = #tpu.pipeline_mode<synchronous>, transform_indices = @transform_3, window_bounds = array<i64: 8, 16>}, {pipeline_mode = #tpu.pipeline_mode<synchronous>, transform_indices = @transform_4, window_bounds = array<i64: 1, 16>}, {pipeline_mode = #tpu.pipeline_mode<synchronous>, transform_indices = @transform_5, window_bounds = array<i64: 3, 3, 16>}, {pipeline_mode = #tpu.pipeline_mode<synchronous>, transform_indices = @transform_6, window_bounds = array<i64: 1, 16>}, {pipeline_mode = #tpu.pipeline_mode<synchronous>, transform_indices = @transform_7, window_bounds = array<i64: 16, 16>}, {pipeline_mode = #tpu.pipeline_mode<synchronous>, transform_indices = @transform_8, window_bounds = array<i64: 1, 16>}, {pipeline_mode = #tpu.pipeline_mode<synchronous>, transform_indices = @transform_9, window_bounds = array<i64: 3, 3, 16>}, {pipeline_mode = #tpu.pipeline_mode<synchronous>, transform_indices = @transform_10, window_bounds = array<i64: 1, 16>}, {pipeline_mode = #tpu.pipeline_mode<synchronous>, transform_indices = @transform_11, window_bounds = array<i64: 16, 8>}, {pipeline_mode = #tpu.pipeline_mode<synchronous>, transform_indices = @transform_12, window_bounds = array<i64: 1, 8>}, {transform_indices = @transform_13, window_bounds = array<i64: 1, 8, 8, 16>}]} {
    %c0 = arith.constant 0 : index
    %c0_0 = arith.constant 0 : index
    %c0_1 = arith.constant 0 : index
    %c0_2 = arith.constant 0 : index
    %0 = vector.load %arg1[%c0, %c0_0, %c0_1, %c0_2] : memref<1x8x8x16xf32, #tpu.memory_space<vmem>>, vector<1x8x8x16xf32>
    %1 = vector.shape_cast %0 : vector<1x8x8x16xf32> to vector<8x8x16xf32>
    %2 = vector.extract_strided_slice %1 {offsets = [0, 0, 0], sizes = [8, 8, 8], strides = [1, 1, 1]} : vector<8x8x16xf32> to vector<8x8x8xf32>
    %3 = vector.extract_strided_slice %1 {offsets = [0, 0, 8], sizes = [8, 8, 8], strides = [1, 1, 1]} : vector<8x8x16xf32> to vector<8x8x8xf32>
    %c0_3 = arith.constant 0 : index
    %c0_4 = arith.constant 0 : index
    %c0_5 = arith.constant 0 : index
    %4 = vector.load %arg2[%c0_3, %c0_4, %c0_5] : memref<3x3x8xf32, #tpu.memory_space<vmem>>, vector<3x3x8xf32>
    %c0_6 = arith.constant 0 : index
    %c0_7 = arith.constant 0 : index
    %5 = vector.load %arg3[%c0_6, %c0_7] : memref<1x8xf32, #tpu.memory_space<vmem>>, vector<1x8xf32>
    %6 = vector.shape_cast %5 : vector<1x8xf32> to vector<8xf32>
    %cst = arith.constant 0.000000e+00 : f32
    %7 = vector.broadcast %cst : f32 to vector<10x10x8xf32>
    %c0_8 = arith.constant 0 : index
    %c0_9 = arith.constant 0 : index
    %c0_10 = arith.constant 0 : index
    %8 = vector.load %arg15[%c0_8, %c0_9, %c0_10] : memref<10x10x8xf32, #tpu.memory_space<vmem>>, vector<10x10x8xf32>
    tpu.vector_store %arg15[%c0_8, %c0_9, %c0_10], %7 {strides = array<i32>} : memref<10x10x8xf32, #tpu.memory_space<vmem>>, vector<10x10x8xf32>,
    %c1 = arith.constant 1 : index
    %c1_11 = arith.constant 1 : index
    %c0_12 = arith.constant 0 : index
    %9 = vector.load %arg15[%c1, %c1_11, %c0_12] : memref<10x10x8xf32, #tpu.memory_space<vmem>>, vector<8x8x8xf32>
    tpu.vector_store %arg15[%c1, %c1_11, %c0_12], %3 {strides = array<i32>} : memref<10x10x8xf32, #tpu.memory_space<vmem>>, vector<8x8x8xf32>,
    %c0_13 = arith.constant 0 : index
    %c0_14 = arith.constant 0 : index
    %c0_15 = arith.constant 0 : index
    %10 = vector.load %arg15[%c0_13, %c0_14, %c0_15] : memref<10x10x8xf32, #tpu.memory_space<vmem>>, vector<10x10x8xf32>
    %cst_16 = arith.constant 0.000000e+00 : f32
    %11 = vector.broadcast %cst_16 : f32 to vector<8x8x8xf32>
    %12 = vector.extract_strided_slice %10 {offsets = [0, 0, 0], sizes = [8, 8, 8], strides = [1, 1, 1]} : vector<10x10x8xf32> to vector<8x8x8xf32>
    %13 = vector.extract_strided_slice %4 {offsets = [0, 0, 0], sizes = [1, 1, 8], strides = [1, 1, 1]} : vector<3x3x8xf32> to vector<1x1x8xf32>
    %14 = vector.shape_cast %13 : vector<1x1x8xf32> to vector<8xf32>
    %15 = vector.shape_cast %14 : vector<8xf32> to vector<1x1x8xf32>
    %16 = vector.broadcast %15 : vector<1x1x8xf32> to vector<8x8x8xf32>
    %17 = arith.mulf %12, %16 : vector<8x8x8xf32>
    %18 = arith.addf %11, %17 : vector<8x8x8xf32>
    %19 = vector.extract_strided_slice %10 {offsets = [0, 1, 0], sizes = [8, 8, 8], strides = [1, 1, 1]} : vector<10x10x8xf32> to vector<8x8x8xf32>
    %20 = vector.extract_strided_slice %4 {offsets = [0, 1, 0], sizes = [1, 1, 8], strides = [1, 1, 1]} : vector<3x3x8xf32> to vector<1x1x8xf32>
    %21 = vector.shape_cast %20 : vector<1x1x8xf32> to vector<8xf32>
    %22 = vector.shape_cast %21 : vector<8xf32> to vector<1x1x8xf32>
    %23 = vector.broadcast %22 : vector<1x1x8xf32> to vector<8x8x8xf32>
    %24 = arith.mulf %19, %23 : vector<8x8x8xf32>
    %25 = arith.addf %18, %24 : vector<8x8x8xf32>
    %26 = vector.extract_strided_slice %10 {offsets = [0, 2, 0], sizes = [8, 8, 8], strides = [1, 1, 1]} : vector<10x10x8xf32> to vector<8x8x8xf32>
    %27 = vector.extract_strided_slice %4 {offsets = [0, 2, 0], sizes = [1, 1, 8], strides = [1, 1, 1]} : vector<3x3x8xf32> to vector<1x1x8xf32>
    %28 = vector.shape_cast %27 : vector<1x1x8xf32> to vector<8xf32>
    %29 = vector.shape_cast %28 : vector<8xf32> to vector<1x1x8xf32>
    %30 = vector.broadcast %29 : vector<1x1x8xf32> to vector<8x8x8xf32>
    %31 = arith.mulf %26, %30 : vector<8x8x8xf32>
    %32 = arith.addf %25, %31 : vector<8x8x8xf32>
    %33 = vector.extract_strided_slice %10 {offsets = [1, 0, 0], sizes = [8, 8, 8], strides = [1, 1, 1]} : vector<10x10x8xf32> to vector<8x8x8xf32>
    %34 = vector.extract_strided_slice %4 {offsets = [1, 0, 0], sizes = [1, 1, 8], strides = [1, 1, 1]} : vector<3x3x8xf32> to vector<1x1x8xf32>
    %35 = vector.shape_cast %34 : vector<1x1x8xf32> to vector<8xf32>
    %36 = vector.shape_cast %35 : vector<8xf32> to vector<1x1x8xf32>
    %37 = vector.broadcast %36 : vector<1x1x8xf32> to vector<8x8x8xf32>
    %38 = arith.mulf %33, %37 : vector<8x8x8xf32>
    %39 = arith.addf %32, %38 : vector<8x8x8xf32>
    %40 = vector.extract_strided_slice %10 {offsets = [1, 1, 0], sizes = [8, 8, 8], strides = [1, 1, 1]} : vector<10x10x8xf32> to vector<8x8x8xf32>
    %41 = vector.extract_strided_slice %4 {offsets = [1, 1, 0], sizes = [1, 1, 8], strides = [1, 1, 1]} : vector<3x3x8xf32> to vector<1x1x8xf32>
    %42 = vector.shape_cast %41 : vector<1x1x8xf32> to vector<8xf32>
    %43 = vector.shape_cast %42 : vector<8xf32> to vector<1x1x8xf32>
    %44 = vector.broadcast %43 : vector<1x1x8xf32> to vector<8x8x8xf32>
    %45 = arith.mulf %40, %44 : vector<8x8x8xf32>
    %46 = arith.addf %39, %45 : vector<8x8x8xf32>
    %47 = vector.extract_strided_slice %10 {offsets = [1, 2, 0], sizes = [8, 8, 8], strides = [1, 1, 1]} : vector<10x10x8xf32> to vector<8x8x8xf32>
    %48 = vector.extract_strided_slice %4 {offsets = [1, 2, 0], sizes = [1, 1, 8], strides = [1, 1, 1]} : vector<3x3x8xf32> to vector<1x1x8xf32>
    %49 = vector.shape_cast %48 : vector<1x1x8xf32> to vector<8xf32>
    %50 = vector.shape_cast %49 : vector<8xf32> to vector<1x1x8xf32>
    %51 = vector.broadcast %50 : vector<1x1x8xf32> to vector<8x8x8xf32>
    %52 = arith.mulf %47, %51 : vector<8x8x8xf32>
    %53 = arith.addf %46, %52 : vector<8x8x8xf32>
    %54 = vector.extract_strided_slice %10 {offsets = [2, 0, 0], sizes = [8, 8, 8], strides = [1, 1, 1]} : vector<10x10x8xf32> to vector<8x8x8xf32>
    %55 = vector.extract_strided_slice %4 {offsets = [2, 0, 0], sizes = [1, 1, 8], strides = [1, 1, 1]} : vector<3x3x8xf32> to vector<1x1x8xf32>
    %56 = vector.shape_cast %55 : vector<1x1x8xf32> to vector<8xf32>
    %57 = vector.shape_cast %56 : vector<8xf32> to vector<1x1x8xf32>
    %58 = vector.broadcast %57 : vector<1x1x8xf32> to vector<8x8x8xf32>
    %59 = arith.mulf %54, %58 : vector<8x8x8xf32>
    %60 = arith.addf %53, %59 : vector<8x8x8xf32>
    %61 = vector.extract_strided_slice %10 {offsets = [2, 1, 0], sizes = [8, 8, 8], strides = [1, 1, 1]} : vector<10x10x8xf32> to vector<8x8x8xf32>
    %62 = vector.extract_strided_slice %4 {offsets = [2, 1, 0], sizes = [1, 1, 8], strides = [1, 1, 1]} : vector<3x3x8xf32> to vector<1x1x8xf32>
    %63 = vector.shape_cast %62 : vector<1x1x8xf32> to vector<8xf32>
    %64 = vector.shape_cast %63 : vector<8xf32> to vector<1x1x8xf32>
    %65 = vector.broadcast %64 : vector<1x1x8xf32> to vector<8x8x8xf32>
    %66 = arith.mulf %61, %65 : vector<8x8x8xf32>
    %67 = arith.addf %60, %66 : vector<8x8x8xf32>
    %68 = vector.extract_strided_slice %10 {offsets = [2, 2, 0], sizes = [8, 8, 8], strides = [1, 1, 1]} : vector<10x10x8xf32> to vector<8x8x8xf32>
    %69 = vector.extract_strided_slice %4 {offsets = [2, 2, 0], sizes = [1, 1, 8], strides = [1, 1, 1]} : vector<3x3x8xf32> to vector<1x1x8xf32>
    %70 = vector.shape_cast %69 : vector<1x1x8xf32> to vector<8xf32>
    %71 = vector.shape_cast %70 : vector<8xf32> to vector<1x1x8xf32>
    %72 = vector.broadcast %71 : vector<1x1x8xf32> to vector<8x8x8xf32>
    %73 = arith.mulf %68, %72 : vector<8x8x8xf32>
    %74 = arith.addf %67, %73 : vector<8x8x8xf32>
    %75 = vector.shape_cast %6 : vector<8xf32> to vector<1x1x8xf32>
    %76 = vector.broadcast %75 : vector<1x1x8xf32> to vector<8x8x8xf32>
    %77 = arith.addf %74, %76 : vector<8x8x8xf32>
    %c0_17 = arith.constant 0 : index
    %c0_18 = arith.constant 0 : index
    %78 = vector.load %arg4[%c0_17, %c0_18] : memref<8x16xf32, #tpu.memory_space<vmem>>, vector<8x16xf32>
    %c0_19 = arith.constant 0 : index
    %c0_20 = arith.constant 0 : index
    %79 = vector.load %arg5[%c0_19, %c0_20] : memref<1x16xf32, #tpu.memory_space<vmem>>, vector<1x16xf32>
    %80 = vector.shape_cast %79 : vector<1x16xf32> to vector<16xf32>
    %81 = vector.shape_cast %77 : vector<8x8x8xf32> to vector<64x8xf32>
    %cst_21 = arith.constant dense<0.000000e+00> : vector<64x16xf32>
    %82 = tpu.matmul %81, %78, %cst_21 {dimension_numbers = #tpu.dot_dimension_numbers<[1], [0], [0], [1], [0, 0, 1, 1], [], []>} : vector<64x8xf32>, vector<8x16xf32>, vector<64x16xf32> -> vector<64x16xf32>
    %83 = vector.shape_cast %80 : vector<16xf32> to vector<1x16xf32>
    %84 = vector.broadcast %83 : vector<1x16xf32> to vector<64x16xf32>
    %85 = arith.addf %82, %84 : vector<64x16xf32>
    %cst_22 = arith.constant 0.000000e+00 : f32
    %86 = vector.broadcast %cst_22 : f32 to vector<64x16xf32>
    %87 = arith.maximumf %85, %86 : vector<64x16xf32>
    %88 = vector.shape_cast %87 : vector<64x16xf32> to vector<8x8x16xf32>
    %c0_23 = arith.constant 0 : index
    %c0_24 = arith.constant 0 : index
    %c0_25 = arith.constant 0 : index
    %89 = vector.load %arg6[%c0_23, %c0_24, %c0_25] : memref<3x3x16xf32, #tpu.memory_space<vmem>>, vector<3x3x16xf32>
    %c0_26 = arith.constant 0 : index
    %c0_27 = arith.constant 0 : index
    %90 = vector.load %arg7[%c0_26, %c0_27] : memref<1x16xf32, #tpu.memory_space<vmem>>, vector<1x16xf32>
    %91 = vector.shape_cast %90 : vector<1x16xf32> to vector<16xf32>
    %cst_28 = arith.constant 0.000000e+00 : f32
    %92 = vector.broadcast %cst_28 : f32 to vector<10x10x16xf32>
    %c0_29 = arith.constant 0 : index
    %c0_30 = arith.constant 0 : index
    %c0_31 = arith.constant 0 : index
    %93 = vector.load %arg16[%c0_29, %c0_30, %c0_31] : memref<10x10x16xf32, #tpu.memory_space<vmem>>, vector<10x10x16xf32>
    tpu.vector_store %arg16[%c0_29, %c0_30, %c0_31], %92 {strides = array<i32>} : memref<10x10x16xf32, #tpu.memory_space<vmem>>, vector<10x10x16xf32>,
    %c1_32 = arith.constant 1 : index
    %c1_33 = arith.constant 1 : index
    %c0_34 = arith.constant 0 : index
    %94 = vector.load %arg16[%c1_32, %c1_33, %c0_34] : memref<10x10x16xf32, #tpu.memory_space<vmem>>, vector<8x8x16xf32>
    tpu.vector_store %arg16[%c1_32, %c1_33, %c0_34], %88 {strides = array<i32>} : memref<10x10x16xf32, #tpu.memory_space<vmem>>, vector<8x8x16xf32>,
    %c0_35 = arith.constant 0 : index
    %c0_36 = arith.constant 0 : index
    %c0_37 = arith.constant 0 : index
    %95 = vector.load %arg16[%c0_35, %c0_36, %c0_37] : memref<10x10x16xf32, #tpu.memory_space<vmem>>, vector<10x10x16xf32>
    %cst_38 = arith.constant 0.000000e+00 : f32
    %96 = vector.broadcast %cst_38 : f32 to vector<8x8x16xf32>
    %97 = vector.extract_strided_slice %95 {offsets = [0, 0, 0], sizes = [8, 8, 16], strides = [1, 1, 1]} : vector<10x10x16xf32> to vector<8x8x16xf32>
    %98 = vector.extract_strided_slice %89 {offsets = [0, 0, 0], sizes = [1, 1, 16], strides = [1, 1, 1]} : vector<3x3x16xf32> to vector<1x1x16xf32>
    %99 = vector.shape_cast %98 : vector<1x1x16xf32> to vector<16xf32>
    %100 = vector.shape_cast %99 : vector<16xf32> to vector<1x1x16xf32>
    %101 = vector.broadcast %100 : vector<1x1x16xf32> to vector<8x8x16xf32>
    %102 = arith.mulf %97, %101 : vector<8x8x16xf32>
    %103 = arith.addf %96, %102 : vector<8x8x16xf32>
    %104 = vector.extract_strided_slice %95 {offsets = [0, 1, 0], sizes = [8, 8, 16], strides = [1, 1, 1]} : vector<10x10x16xf32> to vector<8x8x16xf32>
    %105 = vector.extract_strided_slice %89 {offsets = [0, 1, 0], sizes = [1, 1, 16], strides = [1, 1, 1]} : vector<3x3x16xf32> to vector<1x1x16xf32>
    %106 = vector.shape_cast %105 : vector<1x1x16xf32> to vector<16xf32>
    %107 = vector.shape_cast %106 : vector<16xf32> to vector<1x1x16xf32>
    %108 = vector.broadcast %107 : vector<1x1x16xf32> to vector<8x8x16xf32>
    %109 = arith.mulf %104, %108 : vector<8x8x16xf32>
    %110 = arith.addf %103, %109 : vector<8x8x16xf32>
    %111 = vector.extract_strided_slice %95 {offsets = [0, 2, 0], sizes = [8, 8, 16], strides = [1, 1, 1]} : vector<10x10x16xf32> to vector<8x8x16xf32>
    %112 = vector.extract_strided_slice %89 {offsets = [0, 2, 0], sizes = [1, 1, 16], strides = [1, 1, 1]} : vector<3x3x16xf32> to vector<1x1x16xf32>
    %113 = vector.shape_cast %112 : vector<1x1x16xf32> to vector<16xf32>
    %114 = vector.shape_cast %113 : vector<16xf32> to vector<1x1x16xf32>
    %115 = vector.broadcast %114 : vector<1x1x16xf32> to vector<8x8x16xf32>
    %116 = arith.mulf %111, %115 : vector<8x8x16xf32>
    %117 = arith.addf %110, %116 : vector<8x8x16xf32>
    %118 = vector.extract_strided_slice %95 {offsets = [1, 0, 0], sizes = [8, 8, 16], strides = [1, 1, 1]} : vector<10x10x16xf32> to vector<8x8x16xf32>
    %119 = vector.extract_strided_slice %89 {offsets = [1, 0, 0], sizes = [1, 1, 16], strides = [1, 1, 1]} : vector<3x3x16xf32> to vector<1x1x16xf32>
    %120 = vector.shape_cast %119 : vector<1x1x16xf32> to vector<16xf32>
    %121 = vector.shape_cast %120 : vector<16xf32> to vector<1x1x16xf32>
    %122 = vector.broadcast %121 : vector<1x1x16xf32> to vector<8x8x16xf32>
    %123 = arith.mulf %118, %122 : vector<8x8x16xf32>
    %124 = arith.addf %117, %123 : vector<8x8x16xf32>
    %125 = vector.extract_strided_slice %95 {offsets = [1, 1, 0], sizes = [8, 8, 16], strides = [1, 1, 1]} : vector<10x10x16xf32> to vector<8x8x16xf32>
    %126 = vector.extract_strided_slice %89 {offsets = [1, 1, 0], sizes = [1, 1, 16], strides = [1, 1, 1]} : vector<3x3x16xf32> to vector<1x1x16xf32>
    %127 = vector.shape_cast %126 : vector<1x1x16xf32> to vector<16xf32>
    %128 = vector.shape_cast %127 : vector<16xf32> to vector<1x1x16xf32>
    %129 = vector.broadcast %128 : vector<1x1x16xf32> to vector<8x8x16xf32>
    %130 = arith.mulf %125, %129 : vector<8x8x16xf32>
    %131 = arith.addf %124, %130 : vector<8x8x16xf32>
    %132 = vector.extract_strided_slice %95 {offsets = [1, 2, 0], sizes = [8, 8, 16], strides = [1, 1, 1]} : vector<10x10x16xf32> to vector<8x8x16xf32>
    %133 = vector.extract_strided_slice %89 {offsets = [1, 2, 0], sizes = [1, 1, 16], strides = [1, 1, 1]} : vector<3x3x16xf32> to vector<1x1x16xf32>
    %134 = vector.shape_cast %133 : vector<1x1x16xf32> to vector<16xf32>
    %135 = vector.shape_cast %134 : vector<16xf32> to vector<1x1x16xf32>
    %136 = vector.broadcast %135 : vector<1x1x16xf32> to vector<8x8x16xf32>
    %137 = arith.mulf %132, %136 : vector<8x8x16xf32>
    %138 = arith.addf %131, %137 : vector<8x8x16xf32>
    %139 = vector.extract_strided_slice %95 {offsets = [2, 0, 0], sizes = [8, 8, 16], strides = [1, 1, 1]} : vector<10x10x16xf32> to vector<8x8x16xf32>
    %140 = vector.extract_strided_slice %89 {offsets = [2, 0, 0], sizes = [1, 1, 16], strides = [1, 1, 1]} : vector<3x3x16xf32> to vector<1x1x16xf32>
    %141 = vector.shape_cast %140 : vector<1x1x16xf32> to vector<16xf32>
    %142 = vector.shape_cast %141 : vector<16xf32> to vector<1x1x16xf32>
    %143 = vector.broadcast %142 : vector<1x1x16xf32> to vector<8x8x16xf32>
    %144 = arith.mulf %139, %143 : vector<8x8x16xf32>
    %145 = arith.addf %138, %144 : vector<8x8x16xf32>
    %146 = vector.extract_strided_slice %95 {offsets = [2, 1, 0], sizes = [8, 8, 16], strides = [1, 1, 1]} : vector<10x10x16xf32> to vector<8x8x16xf32>
    %147 = vector.extract_strided_slice %89 {offsets = [2, 1, 0], sizes = [1, 1, 16], strides = [1, 1, 1]} : vector<3x3x16xf32> to vector<1x1x16xf32>
    %148 = vector.shape_cast %147 : vector<1x1x16xf32> to vector<16xf32>
    %149 = vector.shape_cast %148 : vector<16xf32> to vector<1x1x16xf32>
    %150 = vector.broadcast %149 : vector<1x1x16xf32> to vector<8x8x16xf32>
    %151 = arith.mulf %146, %150 : vector<8x8x16xf32>
    %152 = arith.addf %145, %151 : vector<8x8x16xf32>
    %153 = vector.extract_strided_slice %95 {offsets = [2, 2, 0], sizes = [8, 8, 16], strides = [1, 1, 1]} : vector<10x10x16xf32> to vector<8x8x16xf32>
    %154 = vector.extract_strided_slice %89 {offsets = [2, 2, 0], sizes = [1, 1, 16], strides = [1, 1, 1]} : vector<3x3x16xf32> to vector<1x1x16xf32>
    %155 = vector.shape_cast %154 : vector<1x1x16xf32> to vector<16xf32>
    %156 = vector.shape_cast %155 : vector<16xf32> to vector<1x1x16xf32>
    %157 = vector.broadcast %156 : vector<1x1x16xf32> to vector<8x8x16xf32>
    %158 = arith.mulf %153, %157 : vector<8x8x16xf32>
    %159 = arith.addf %152, %158 : vector<8x8x16xf32>
    %160 = vector.shape_cast %91 : vector<16xf32> to vector<1x1x16xf32>
    %161 = vector.broadcast %160 : vector<1x1x16xf32> to vector<8x8x16xf32>
    %162 = arith.addf %159, %161 : vector<8x8x16xf32>
    %c0_39 = arith.constant 0 : index
    %c0_40 = arith.constant 0 : index
    %163 = vector.load %arg8[%c0_39, %c0_40] : memref<16x16xf32, #tpu.memory_space<vmem>>, vector<16x16xf32>
    %c0_41 = arith.constant 0 : index
    %c0_42 = arith.constant 0 : index
    %164 = vector.load %arg9[%c0_41, %c0_42] : memref<1x16xf32, #tpu.memory_space<vmem>>, vector<1x16xf32>
    %165 = vector.shape_cast %164 : vector<1x16xf32> to vector<16xf32>
    %166 = vector.shape_cast %162 : vector<8x8x16xf32> to vector<64x16xf32>
    %cst_43 = arith.constant dense<0.000000e+00> : vector<64x16xf32>
    %167 = tpu.matmul %166, %163, %cst_43 {dimension_numbers = #tpu.dot_dimension_numbers<[1], [0], [0], [1], [0, 0, 1, 1], [], []>} : vector<64x16xf32>, vector<16x16xf32>, vector<64x16xf32> -> vector<64x16xf32>
    %168 = vector.shape_cast %165 : vector<16xf32> to vector<1x16xf32>
    %169 = vector.broadcast %168 : vector<1x16xf32> to vector<64x16xf32>
    %170 = arith.addf %167, %169 : vector<64x16xf32>
    %cst_44 = arith.constant 0.000000e+00 : f32
    %171 = vector.broadcast %cst_44 : f32 to vector<64x16xf32>
    %172 = arith.maximumf %170, %171 : vector<64x16xf32>
    %173 = vector.shape_cast %172 : vector<64x16xf32> to vector<8x8x16xf32>
    %c0_45 = arith.constant 0 : index
    %c0_46 = arith.constant 0 : index
    %c0_47 = arith.constant 0 : index
    %174 = vector.load %arg10[%c0_45, %c0_46, %c0_47] : memref<3x3x16xf32, #tpu.memory_space<vmem>>, vector<3x3x16xf32>
    %c0_48 = arith.constant 0 : index
    %c0_49 = arith.constant 0 : index
    %175 = vector.load %arg11[%c0_48, %c0_49] : memref<1x16xf32, #tpu.memory_space<vmem>>, vector<1x16xf32>
    %176 = vector.shape_cast %175 : vector<1x16xf32> to vector<16xf32>
    %cst_50 = arith.constant 0.000000e+00 : f32
    %177 = vector.broadcast %cst_50 : f32 to vector<10x10x16xf32>
    %c0_51 = arith.constant 0 : index
    %c0_52 = arith.constant 0 : index
    %c0_53 = arith.constant 0 : index
    %178 = vector.load %arg16[%c0_51, %c0_52, %c0_53] : memref<10x10x16xf32, #tpu.memory_space<vmem>>, vector<10x10x16xf32>
    tpu.vector_store %arg16[%c0_51, %c0_52, %c0_53], %177 {strides = array<i32>} : memref<10x10x16xf32, #tpu.memory_space<vmem>>, vector<10x10x16xf32>,
    %c1_54 = arith.constant 1 : index
    %c1_55 = arith.constant 1 : index
    %c0_56 = arith.constant 0 : index
    %179 = vector.load %arg16[%c1_54, %c1_55, %c0_56] : memref<10x10x16xf32, #tpu.memory_space<vmem>>, vector<8x8x16xf32>
    tpu.vector_store %arg16[%c1_54, %c1_55, %c0_56], %173 {strides = array<i32>} : memref<10x10x16xf32, #tpu.memory_space<vmem>>, vector<8x8x16xf32>,
    %c0_57 = arith.constant 0 : index
    %c0_58 = arith.constant 0 : index
    %c0_59 = arith.constant 0 : index
    %180 = vector.load %arg16[%c0_57, %c0_58, %c0_59] : memref<10x10x16xf32, #tpu.memory_space<vmem>>, vector<10x10x16xf32>
    %cst_60 = arith.constant 0.000000e+00 : f32
    %181 = vector.broadcast %cst_60 : f32 to vector<8x8x16xf32>
    %182 = vector.extract_strided_slice %180 {offsets = [0, 0, 0], sizes = [8, 8, 16], strides = [1, 1, 1]} : vector<10x10x16xf32> to vector<8x8x16xf32>
    %183 = vector.extract_strided_slice %174 {offsets = [0, 0, 0], sizes = [1, 1, 16], strides = [1, 1, 1]} : vector<3x3x16xf32> to vector<1x1x16xf32>
    %184 = vector.shape_cast %183 : vector<1x1x16xf32> to vector<16xf32>
    %185 = vector.shape_cast %184 : vector<16xf32> to vector<1x1x16xf32>
    %186 = vector.broadcast %185 : vector<1x1x16xf32> to vector<8x8x16xf32>
    %187 = arith.mulf %182, %186 : vector<8x8x16xf32>
    %188 = arith.addf %181, %187 : vector<8x8x16xf32>
    %189 = vector.extract_strided_slice %180 {offsets = [0, 1, 0], sizes = [8, 8, 16], strides = [1, 1, 1]} : vector<10x10x16xf32> to vector<8x8x16xf32>
    %190 = vector.extract_strided_slice %174 {offsets = [0, 1, 0], sizes = [1, 1, 16], strides = [1, 1, 1]} : vector<3x3x16xf32> to vector<1x1x16xf32>
    %191 = vector.shape_cast %190 : vector<1x1x16xf32> to vector<16xf32>
    %192 = vector.shape_cast %191 : vector<16xf32> to vector<1x1x16xf32>
    %193 = vector.broadcast %192 : vector<1x1x16xf32> to vector<8x8x16xf32>
    %194 = arith.mulf %189, %193 : vector<8x8x16xf32>
    %195 = arith.addf %188, %194 : vector<8x8x16xf32>
    %196 = vector.extract_strided_slice %180 {offsets = [0, 2, 0], sizes = [8, 8, 16], strides = [1, 1, 1]} : vector<10x10x16xf32> to vector<8x8x16xf32>
    %197 = vector.extract_strided_slice %174 {offsets = [0, 2, 0], sizes = [1, 1, 16], strides = [1, 1, 1]} : vector<3x3x16xf32> to vector<1x1x16xf32>
    %198 = vector.shape_cast %197 : vector<1x1x16xf32> to vector<16xf32>
    %199 = vector.shape_cast %198 : vector<16xf32> to vector<1x1x16xf32>
    %200 = vector.broadcast %199 : vector<1x1x16xf32> to vector<8x8x16xf32>
    %201 = arith.mulf %196, %200 : vector<8x8x16xf32>
    %202 = arith.addf %195, %201 : vector<8x8x16xf32>
    %203 = vector.extract_strided_slice %180 {offsets = [1, 0, 0], sizes = [8, 8, 16], strides = [1, 1, 1]} : vector<10x10x16xf32> to vector<8x8x16xf32>
    %204 = vector.extract_strided_slice %174 {offsets = [1, 0, 0], sizes = [1, 1, 16], strides = [1, 1, 1]} : vector<3x3x16xf32> to vector<1x1x16xf32>
    %205 = vector.shape_cast %204 : vector<1x1x16xf32> to vector<16xf32>
    %206 = vector.shape_cast %205 : vector<16xf32> to vector<1x1x16xf32>
    %207 = vector.broadcast %206 : vector<1x1x16xf32> to vector<8x8x16xf32>
    %208 = arith.mulf %203, %207 : vector<8x8x16xf32>
    %209 = arith.addf %202, %208 : vector<8x8x16xf32>
    %210 = vector.extract_strided_slice %180 {offsets = [1, 1, 0], sizes = [8, 8, 16], strides = [1, 1, 1]} : vector<10x10x16xf32> to vector<8x8x16xf32>
    %211 = vector.extract_strided_slice %174 {offsets = [1, 1, 0], sizes = [1, 1, 16], strides = [1, 1, 1]} : vector<3x3x16xf32> to vector<1x1x16xf32>
    %212 = vector.shape_cast %211 : vector<1x1x16xf32> to vector<16xf32>
    %213 = vector.shape_cast %212 : vector<16xf32> to vector<1x1x16xf32>
    %214 = vector.broadcast %213 : vector<1x1x16xf32> to vector<8x8x16xf32>
    %215 = arith.mulf %210, %214 : vector<8x8x16xf32>
    %216 = arith.addf %209, %215 : vector<8x8x16xf32>
    %217 = vector.extract_strided_slice %180 {offsets = [1, 2, 0], sizes = [8, 8, 16], strides = [1, 1, 1]} : vector<10x10x16xf32> to vector<8x8x16xf32>
    %218 = vector.extract_strided_slice %174 {offsets = [1, 2, 0], sizes = [1, 1, 16], strides = [1, 1, 1]} : vector<3x3x16xf32> to vector<1x1x16xf32>
    %219 = vector.shape_cast %218 : vector<1x1x16xf32> to vector<16xf32>
    %220 = vector.shape_cast %219 : vector<16xf32> to vector<1x1x16xf32>
    %221 = vector.broadcast %220 : vector<1x1x16xf32> to vector<8x8x16xf32>
    %222 = arith.mulf %217, %221 : vector<8x8x16xf32>
    %223 = arith.addf %216, %222 : vector<8x8x16xf32>
    %224 = vector.extract_strided_slice %180 {offsets = [2, 0, 0], sizes = [8, 8, 16], strides = [1, 1, 1]} : vector<10x10x16xf32> to vector<8x8x16xf32>
    %225 = vector.extract_strided_slice %174 {offsets = [2, 0, 0], sizes = [1, 1, 16], strides = [1, 1, 1]} : vector<3x3x16xf32> to vector<1x1x16xf32>
    %226 = vector.shape_cast %225 : vector<1x1x16xf32> to vector<16xf32>
    %227 = vector.shape_cast %226 : vector<16xf32> to vector<1x1x16xf32>
    %228 = vector.broadcast %227 : vector<1x1x16xf32> to vector<8x8x16xf32>
    %229 = arith.mulf %224, %228 : vector<8x8x16xf32>
    %230 = arith.addf %223, %229 : vector<8x8x16xf32>
    %231 = vector.extract_strided_slice %180 {offsets = [2, 1, 0], sizes = [8, 8, 16], strides = [1, 1, 1]} : vector<10x10x16xf32> to vector<8x8x16xf32>
    %232 = vector.extract_strided_slice %174 {offsets = [2, 1, 0], sizes = [1, 1, 16], strides = [1, 1, 1]} : vector<3x3x16xf32> to vector<1x1x16xf32>
    %233 = vector.shape_cast %232 : vector<1x1x16xf32> to vector<16xf32>
    %234 = vector.shape_cast %233 : vector<16xf32> to vector<1x1x16xf32>
    %235 = vector.broadcast %234 : vector<1x1x16xf32> to vector<8x8x16xf32>
    %236 = arith.mulf %231, %235 : vector<8x8x16xf32>
    %237 = arith.addf %230, %236 : vector<8x8x16xf32>
    %238 = vector.extract_strided_slice %180 {offsets = [2, 2, 0], sizes = [8, 8, 16], strides = [1, 1, 1]} : vector<10x10x16xf32> to vector<8x8x16xf32>
    %239 = vector.extract_strided_slice %174 {offsets = [2, 2, 0], sizes = [1, 1, 16], strides = [1, 1, 1]} : vector<3x3x16xf32> to vector<1x1x16xf32>
    %240 = vector.shape_cast %239 : vector<1x1x16xf32> to vector<16xf32>
    %241 = vector.shape_cast %240 : vector<16xf32> to vector<1x1x16xf32>
    %242 = vector.broadcast %241 : vector<1x1x16xf32> to vector<8x8x16xf32>
    %243 = arith.mulf %238, %242 : vector<8x8x16xf32>
    %244 = arith.addf %237, %243 : vector<8x8x16xf32>
    %245 = vector.shape_cast %176 : vector<16xf32> to vector<1x1x16xf32>
    %246 = vector.broadcast %245 : vector<1x1x16xf32> to vector<8x8x16xf32>
    %247 = arith.addf %244, %246 : vector<8x8x16xf32>
    %c0_61 = arith.constant 0 : index
    %c0_62 = arith.constant 0 : index
    %248 = vector.load %arg12[%c0_61, %c0_62] : memref<16x8xf32, #tpu.memory_space<vmem>>, vector<16x8xf32>
    %c0_63 = arith.constant 0 : index
    %c0_64 = arith.constant 0 : index
    %249 = vector.load %arg13[%c0_63, %c0_64] : memref<1x8xf32, #tpu.memory_space<vmem>>, vector<1x8xf32>
    %250 = vector.shape_cast %249 : vector<1x8xf32> to vector<8xf32>
    %251 = vector.shape_cast %247 : vector<8x8x16xf32> to vector<64x16xf32>
    %cst_65 = arith.constant dense<0.000000e+00> : vector<64x8xf32>
    %252 = tpu.matmul %251, %248, %cst_65 {dimension_numbers = #tpu.dot_dimension_numbers<[1], [0], [0], [1], [0, 0, 1, 1], [], []>} : vector<64x16xf32>, vector<16x8xf32>, vector<64x8xf32> -> vector<64x8xf32>
    %253 = vector.shape_cast %250 : vector<8xf32> to vector<1x8xf32>
    %254 = vector.broadcast %253 : vector<1x8xf32> to vector<64x8xf32>
    %255 = arith.addf %252, %254 : vector<64x8xf32>
    %cst_66 = arith.constant 0.000000e+00 : f32
    %256 = vector.broadcast %cst_66 : f32 to vector<64x8xf32>
    %257 = arith.maximumf %255, %256 : vector<64x8xf32>
    %258 = vector.shape_cast %257 : vector<64x8xf32> to vector<8x8x8xf32>
    %259 = tpu.concatenate %2, %258 in 2 : vector<8x8x8xf32>, vector<8x8x8xf32> -> vector<8x8x16xf32>
    %c0_67 = arith.constant 0 : index
    %c0_68 = arith.constant 0 : index
    %c0_69 = arith.constant 0 : index
    %c0_70 = arith.constant 0 : index
    %260 = vector.load %arg14[%c0_67, %c0_68, %c0_69, %c0_70] : memref<1x8x8x16xf32, #tpu.memory_space<vmem>>, vector<1x8x8x16xf32>
    %261 = vector.shape_cast %260 : vector<1x8x8x16xf32> to vector<8x8x16xf32>
    %262 = vector.shape_cast %259 : vector<8x8x16xf32> to vector<1x8x8x16xf32>
    tpu.vector_store %arg14[%c0_67, %c0_68, %c0_69, %c0_70], %262 {strides = array<i32>} : memref<1x8x8x16xf32, #tpu.memory_space<vmem>>, vector<1x8x8x16xf32>,
    return
  }
  func.func @transform_0(%arg0: i32) -> (i32, i32, i32, i32) {
    %c0_i32 = arith.constant 0 : i32
    %c0_i32_0 = arith.constant 0 : i32
    %c0_i32_1 = arith.constant 0 : i32
    %c0_i32_2 = arith.constant 0 : i32
    return %arg0, %c0_i32, %c0_i32_0, %c0_i32_1 : i32, i32, i32, i32
  }
  func.func @transform_1(%arg0: i32) -> (i32, i32, i32) {
    %c0_i32 = arith.constant 0 : i32
    %c0_i32_0 = arith.constant 0 : i32
    %c0_i32_1 = arith.constant 0 : i32
    %c0_i32_2 = arith.constant 0 : i32
    return %c0_i32, %c0_i32_0, %c0_i32_1 : i32, i32, i32
  }
  func.func @transform_2(%arg0: i32) -> (i32, i32) {
    %c0_i32 = arith.constant 0 : i32
    %c0_i32_0 = arith.constant 0 : i32
    %c0_i32_1 = arith.constant 0 : i32
    return %c0_i32, %c0_i32_0 : i32, i32
  }
  func.func @transform_3(%arg0: i32) -> (i32, i32) {
    %c0_i32 = arith.constant 0 : i32
    %c0_i32_0 = arith.constant 0 : i32
    %c0_i32_1 = arith.constant 0 : i32
    return %c0_i32, %c0_i32_0 : i32, i32
  }
  func.func @transform_4(%arg0: i32) -> (i32, i32) {
    %c0_i32 = arith.constant 0 : i32
    %c0_i32_0 = arith.constant 0 : i32
    %c0_i32_1 = arith.constant 0 : i32
    return %c0_i32, %c0_i32_0 : i32, i32
  }
  func.func @transform_5(%arg0: i32) -> (i32, i32, i32) {
    %c0_i32 = arith.constant 0 : i32
    %c0_i32_0 = arith.constant 0 : i32
    %c0_i32_1 = arith.constant 0 : i32
    %c0_i32_2 = arith.constant 0 : i32
    return %c0_i32, %c0_i32_0, %c0_i32_1 : i32, i32, i32
  }
  func.func @transform_6(%arg0: i32) -> (i32, i32) {
    %c0_i32 = arith.constant 0 : i32
    %c0_i32_0 = arith.constant 0 : i32
    %c0_i32_1 = arith.constant 0 : i32
    return %c0_i32, %c0_i32_0 : i32, i32
  }
  func.func @transform_7(%arg0: i32) -> (i32, i32) {
    %c0_i32 = arith.constant 0 : i32
    %c0_i32_0 = arith.constant 0 : i32
    %c0_i32_1 = arith.constant 0 : i32
    return %c0_i32, %c0_i32_0 : i32, i32
  }
  func.func @transform_8(%arg0: i32) -> (i32, i32) {
    %c0_i32 = arith.constant 0 : i32
    %c0_i32_0 = arith.constant 0 : i32
    %c0_i32_1 = arith.constant 0 : i32
    return %c0_i32, %c0_i32_0 : i32, i32
  }
  func.func @transform_9(%arg0: i32) -> (i32, i32, i32) {
    %c0_i32 = arith.constant 0 : i32
    %c0_i32_0 = arith.constant 0 : i32
    %c0_i32_1 = arith.constant 0 : i32
    %c0_i32_2 = arith.constant 0 : i32
    return %c0_i32, %c0_i32_0, %c0_i32_1 : i32, i32, i32
  }
  func.func @transform_10(%arg0: i32) -> (i32, i32) {
    %c0_i32 = arith.constant 0 : i32
    %c0_i32_0 = arith.constant 0 : i32
    %c0_i32_1 = arith.constant 0 : i32
    return %c0_i32, %c0_i32_0 : i32, i32
  }
  func.func @transform_11(%arg0: i32) -> (i32, i32) {
    %c0_i32 = arith.constant 0 : i32
    %c0_i32_0 = arith.constant 0 : i32
    %c0_i32_1 = arith.constant 0 : i32
    return %c0_i32, %c0_i32_0 : i32, i32
  }
  func.func @transform_12(%arg0: i32) -> (i32, i32) {
    %c0_i32 = arith.constant 0 : i32
    %c0_i32_0 = arith.constant 0 : i32
    %c0_i32_1 = arith.constant 0 : i32
    return %c0_i32, %c0_i32_0 : i32, i32
  }
  func.func @transform_13(%arg0: i32) -> (i32, i32, i32, i32) {
    %c0_i32 = arith.constant 0 : i32
    %c0_i32_0 = arith.constant 0 : i32
    %c0_i32_1 = arith.constant 0 : i32
    %c0_i32_2 = arith.constant 0 : i32
    return %arg0, %c0_i32, %c0_i32_0, %c0_i32_1 : i32, i32, i32, i32
  }
}

</mosaic_0001>

<bundles_post_ra>
// kernel: choice_block_x_forward.1
= control target key start
LH: loop header
LB: loop body
LE: loop exit
PB: predicated region body
PF: predicated region fallthrough
CT: control target
= control target key end

     0   :  { %s2995_s25 = smov 0   ;;  %s4259_s0 = inlined_call_operand.vmem [shape: f32[2,8,8,16], index: 0, kind: input, shape index: {}]   ;;  %s4260_s1 = inlined_call_operand.vmem [shape: f32[3,3,8], index: 1, kind: input, shape index: {}]   ;;  %s4261_s2 = inlined_call_operand.vmem [shape: f32[1,8], index: 2, kind: input, shape index: {}]   ;;  %s4262_s3 = inlined_call_operand.vmem [shape: f32[8,16], index: 3, kind: input, shape index: {}]   ;;  %s4263_s4 = inlined_call_operand.vmem [shape: f32[1,16], index: 4, kind: input, shape index: {}]   ;;  %s4264_s5 = inlined_call_operand.vmem [shape: f32[3,3,16], index: 5, kind: input, shape index: {}]   ;;  %s4265_s6 = inlined_call_operand.vmem [shape: f32[1,16], index: 6, kind: input, shape index: {}]   ;;  %s4266_s7 = inlined_call_operand.vmem [shape: f32[16,16], index: 7, kind: input, shape index: {}]   ;;  %s4267_s8 = inlined_call_operand.vmem [shape: f32[1,16], index: 8, kind: input, shape index: {}]   ;;  %s4268_s9 = inlined_call_operand.vmem [shape: f32[3,3,16], index: 9, kind: input, shape index: {}]   ;;  %s4269_s10 = inlined_call_operand.vmem [shape: f32[1,16], index: 10, kind: input, shape index: {}]   ;;  %s4270_s11 = inlined_call_operand.vmem [shape: f32[16,8], index: 11, kind: input, shape index: {}]   ;;  %s4271_s12 = inlined_call_operand.vmem [shape: f32[1,8], index: 12, kind: input, shape index: {}]   ;;  %s4272_s13 = inlined_call_operand.vmem [shape: f32[2,8,8,16], index: 13, kind: output, shape index: {}]  }
   0x1 LB: > { %s2775_s26 = sadd.s32 4294967295, %s2920_s25   ;;  %p2779_p0 = scmp.ge.s32.totalorder %s2920_s25, 1  ;;  %s2920_s25 = sphi %s2995_s25, %s23_s25  }
   0x2   : > { %p387_p1 = scmp.lt.s32.totalorder %s2920_s25, 3 }
   0x4   : > { %p388_p2 = pnand %p2779_p0, %p387_p1 }
   0x5   : > { %p3003_p3 = scmp.lt.s32.totalorder (!%p388_p2), %s2775_s26, 1  ;;  %s2923_s15 = smov (!%p388_p2), 120  }
   0x6   : > { %391 = sbr.rel (%p388_p2) target bundleno = 1034 (0x40a), region = 72  ;;  %s2924_s17 = smov (!%p388_p2), 8  }
   0xb   : > { %vm453_vm0 = vcmask 64512   ;;  %vm455_vm1 = vcmask 58368   ;;  %v2922_v0 = vmov 0.0   ;;  %s4275_s26 = smov (!%p3003_p3, %s2775_s26), 1  ;;  %v1068_v9 = vld [vmem:[%s4262_s3] sm:$0xff]  ;;  %v536_v10 = vlaneseq }
   0xc   : > { %461 = vst.msk [vmem:[#allocation2 + $0x30] sm:$0xff] %vm453_vm0, %v2922_v0  ;;  %454 = vst.msk [vmem:[#allocation2] sm:$0xff] %vm453_vm0, %v2922_v0  ;;  %s2816_s28 = sshll.u32 %s4275_s26, 6  ;;  %2847 = vmatprep.subr.mxu0 %v1068_v9  ;;  %2893 = vmatprep.subr.mxu1 %v1068_v9  ;;  %v449_v13 = vld [vmem:[%s4260_s1] sm:$0x7]  ;;  %vm592_vm2 = vcmask 1046528  }
   0xd   : > { %462 = vst.msk [vmem:[#allocation2 + $0x38] sm:$0x3] %vm455_vm1, %v2922_v0  ;;  %456 = vst.msk [vmem:[#allocation2 + $0x8] sm:$0x3] %vm455_vm1, %v2922_v0  ;;  %s3057_s14 = scalar_lea.vmem %s4259_s0, %s2816_s28  ;;  %2848 = vmatpush3.msra.mxu0 %v1068_v9  ;;  %2894 = vmatpush3.msra.mxu1 %v1068_v9  ;;  %v537_v11 = vshrl.u32 %v536_v10, 7  ;;  %vm669_vm3 = vcmask 1045504   ;;  %s4222_s20 = scalar_lea.vmem %s4272_s13, %s2816_s28 }
   0xe   : > { %457 = vst.msk [vmem:[#allocation2 + $0x10] sm:$0xff] %vm453_vm0, %v2922_v0  ;;  %459 = vst.msk [vmem:[#allocation2 + $0x20] sm:$0xff] %vm453_vm0, %v2922_v0  ;;  %v443_v1 = vld [vmem:[%s3057_s14 + $0x10] sm:$0xff]  ;;  %v441_v2 = vld [vmem:[%s3057_s14] sm:$0xff]  ;;  %vm1217_vm4 = vcmask 130048   ;;  %vm1219_vm5 = vcmask 123904  }
   0xf   : > { %458 = vst.msk [vmem:[#allocation2 + $0x18] sm:$0x3] %vm455_vm1, %v2922_v0  ;;  %460 = vst.msk [vmem:[#allocation2 + $0x28] sm:$0x3] %vm455_vm1, %v2922_v0  ;;  %487 = vrot.lane.b32.xlu1 %v443_v1, %s2923_s15  ;;  %483 = vrot.lane.b32.xlu0 %v441_v2, %s2923_s15  ;;  %v444_v3 = vld [vmem:[%s3057_s14 + $0x18] sm:$0xff]  ;;  %v442_v4 = vld [vmem:[%s3057_s14 + $0x8] sm:$0xff] }
  0x10   : > { %463 = vst.msk [vmem:[#allocation2 + $0x40] sm:$0xff] %vm453_vm0, %v2922_v0  ;;  %465 = vst.msk [vmem:[#allocation2 + $0x50] sm:$0xff] %vm453_vm0, %v2922_v0  ;;  %v446_v5 = vld [vmem:[%s3057_s14 + $0x28] sm:$0xff]  ;;  %v445_v6 = vld [vmem:[%s3057_s14 + $0x20] sm:$0xff]  ;;  %v3070_v12 = vsub.s32 1, %v537_v11  ;;  %v3078_v15 = vsub.s32 2, %v537_v11 }
  0x11   : > { %464 = vst.msk [vmem:[#allocation2 + $0x48] sm:$0x3] %vm455_vm1, %v2922_v0  ;;  %466 = vst.msk [vmem:[#allocation2 + $0x58] sm:$0x3] %vm455_vm1, %v2922_v0  ;;  %v447_v7 = vld [vmem:[%s3057_s14 + $0x30] sm:$0xff]  ;;  %v448_v8 = vld [vmem:[%s3057_s14 + $0x38] sm:$0xff] }
  0x12   : > { %467 = vst.msk [vmem:[#allocation2 + $0x60] sm:$0xff] %vm453_vm0, %v2922_v0  ;;  %469 = vst.msk [vmem:[#allocation2 + $0x70] sm:$0xff] %vm453_vm0, %v2922_v0  ;;  %v3076_v14 = vrot.slane %v449_v13, %v3070_v12  ;;  %v3080_v18 = vsub.s32 0, %v537_v11  ;;  %v3085_v21 = vrot.slane %v449_v13, %v3078_v15  ;;  %v450_v33 = vld [vmem:[%s4260_s1 + $0x4] sm:$0x7] }
  0x13   : > { %468 = vst.msk [vmem:[#allocation2 + $0x68] sm:$0x3] %vm455_vm1, %v2922_v0  ;;  %470 = vst.msk [vmem:[#allocation2 + $0x78] sm:$0x3] %vm455_vm1, %v2922_v0  ;;  %489 = vrot.lane.b32.xlu1 %v444_v3, %s2923_s15  ;;  %485 = vrot.lane.b32.xlu0 %v442_v4, %s2923_s15  ;;  %v516_v16 = vld [vmem:[#allocation2] sm:$0xff]  ;;  %v3109_v40 = vrot.slane %v450_v33, %v3070_v12  ;;  %v3112_v41 = vrot.slane %v450_v33, %v3078_v15 }
  0x14   : > { %471 = vst.msk [vmem:[#allocation2 + $0x80] sm:$0xff] %vm453_vm0, %v2922_v0  ;;  %473 = vst.msk [vmem:[#allocation2 + $0x90] sm:$0xff] %vm453_vm0, %v2922_v0  ;;  %v517_v17 = vld [vmem:[#allocation2 + $0x8] sm:$0x3]  ;;  %v560_v19 = vmul.f32 %v3076_v14, %v516_v16  ;;  %v3088_v22 = vrot.slane %v449_v13, %v3080_v18  ;;  %v637_v25 = vmul.f32 %v3085_v21, %v516_v16 }
  0x15   : > { %472 = vst.msk [vmem:[#allocation2 + $0x88] sm:$0x3] %vm455_vm1, %v2922_v0  ;;  %474 = vst.msk [vmem:[#allocation2 + $0x98] sm:$0x3] %vm455_vm1, %v2922_v0  ;;  %v561_v20 = vmul.f32 %v3076_v14, %v517_v17  ;;  %v638_v26 = vmul.f32 %v3085_v21, %v517_v17  ;;  %v451_v38 = vld [vmem:[%s4260_s1 + $0x8] sm:$0x7]  ;;  %v3106_v39 = vrot.slane %v450_v33, %v3080_v18 }
  0x16   : > { %v593_v23 = vrot.slane %v560_v19, 1  ;;  %v540_v27 = vmul.f32 %v3088_v22, %v516_v16  ;;  %v670_v31 = vrot.slane %v637_v25, 2  ;;  %v3117_v48 = vrot.slane %v451_v38, %v3080_v18  ;;  %1223 = vst.msk [vmem:[#allocation3 + $0x20] sm:$0xff] %vm1217_vm4, %v2922_v0  ;;  %1218 = vst.msk [vmem:[#allocation3] sm:$0xff] %vm1217_vm4, %v2922_v0 }
  0x17   : > { %493 = vrot.lane.b32.xlu1 %v446_v5, %s2923_s15  ;;  %491 = vrot.lane.b32.xlu0 %v445_v6, %s2923_s15  ;;  %v594_v24 = vrot.slane %v561_v20, 1  ;;  %v671_v32 = vrot.slane %v638_v26, 2  ;;  %v3120_v49 = vrot.slane %v451_v38, %v3070_v12  ;;  %v3123_v50 = vrot.slane %v451_v38, %v3078_v15  ;;  %1224 = vst.msk [vmem:[#allocation3 + $0x28] sm:$0x3] %vm1219_vm5, %v2922_v0 }
  0x18   : > { %1220 = vst.msk [vmem:[#allocation3 + $0x8] sm:$0x3] %vm1219_vm5, %v2922_v0  ;;  %1222 = vst.msk [vmem:[#allocation3 + $0x18] sm:$0x3] %vm1219_vm5, %v2922_v0 }
  0x19   : > { %v595_v30 = vsel %vm592_vm2, %v593_v23, %v594_v24  ;;  %v672_v37 = vsel %vm669_vm3, %v670_v31, %v671_v32  ;;  %1221 = vst.msk [vmem:[#allocation3 + $0x10] sm:$0xff] %vm1217_vm4, %v2922_v0  ;;  %1225 = vst.msk [vmem:[#allocation3 + $0x30] sm:$0xff] %vm1217_vm4, %v2922_v0 }
  0x1a   : > { %v625_v34 = vadd.f32 %v595_v30, %v540_v27  ;;  %1226 = vst.msk [vmem:[#allocation3 + $0x38] sm:$0x3] %vm1219_vm5, %v2922_v0  ;;  %1228 = vst.msk [vmem:[#allocation3 + $0x48] sm:$0x3] %vm1219_vm5, %v2922_v0 }
  0x1b   : > { %495 = vrot.lane.b32.xlu0 %v447_v7, %s2923_s15  ;;  %497 = vrot.lane.b32.xlu1 %v448_v8, %s2923_s15  ;;  %v3114_v43 = vld [vmem:[#allocation2 + $0x90] sm:$0xff]  ;;  %1227 = vst.msk [vmem:[#allocation3 + $0x40] sm:$0xff] %vm1217_vm4, %v2922_v0  ;;  %1229 = vst.msk [vmem:[#allocation3 + $0x50] sm:$0xff] %vm1217_vm4, %v2922_v0 }
  0x1c   : > { %v702_v42 = vadd.f32 %v672_v37, %v625_v34  ;;  %v3136_v58 = vmul.f32 %v3120_v49, %v3114_v43  ;;  %1230 = vst.msk [vmem:[#allocation3 + $0x58] sm:$0x3] %vm1219_vm5, %v2922_v0  ;;  %1232 = vst.msk [vmem:[#allocation3 + $0x68] sm:$0x3] %vm1219_vm5, %v2922_v0 }
  0x1d   : > { %1231 = vst.msk [vmem:[#allocation3 + $0x60] sm:$0xff] %vm1217_vm4, %v2922_v0  ;;  %1233 = vst.msk [vmem:[#allocation3 + $0x70] sm:$0xff] %vm1217_vm4, %v2922_v0 }
  0x1e   : > { %1234 = vst.msk [vmem:[#allocation3 + $0x78] sm:$0x3] %vm1219_vm5, %v2922_v0  ;;  %1236 = vst.msk [vmem:[#allocation3 + $0x88] sm:$0x3] %vm1219_vm5, %v2922_v0 }
  0x1f   : > { %1235 = vst.msk [vmem:[#allocation3 + $0x80] sm:$0xff] %vm1217_vm4, %v2922_v0  ;;  %1237 = vst.msk [vmem:[#allocation3 + $0x90] sm:$0xff] %vm1217_vm4, %v2922_v0 }
  0x20   : > { %1238 = vst.msk [vmem:[#allocation3 + $0x98] sm:$0x3] %vm1219_vm5, %v2922_v0 }
  0x81   : > { %v488_v28 = vpop.permute.xlu1 %487  ;;  %v484_v29 = vpop.permute.xlu0 %483 }
  0x82   : > { %510 = vst.msk [vmem:[#allocation2 + $0x31] sm:$0xff] %vm453_vm0, %v488_v28  ;;  %508 = vst.msk [vmem:[#allocation2 + $0x11] sm:$0xff] %vm453_vm0, %v484_v29 }
  0x85   : > { %v490_v35 = vpop.permute.xlu1 %489  ;;  %v486_v36 = vpop.permute.xlu0 %485 }
  0x86   : > { %511 = vst.msk [vmem:[#allocation2 + $0x41] sm:$0xff] %vm453_vm0, %v490_v35  ;;  %509 = vst.msk [vmem:[#allocation2 + $0x21] sm:$0xff] %vm453_vm0, %v486_v36 }
  0x89   : > { %v494_v44 = vpop.permute.xlu1 %493  ;;  %v492_v45 = vpop.permute.xlu0 %491  ;;  %v518_v46 = vld [vmem:[#allocation2 + $0x10] sm:$0xff]  ;;  %v519_v47 = vld [vmem:[#allocation2 + $0x18] sm:$0x3] }
  0x8a   : > { %513 = vst.msk [vmem:[#allocation2 + $0x61] sm:$0xff] %vm453_vm0, %v494_v44  ;;  %512 = vst.msk [vmem:[#allocation2 + $0x51] sm:$0xff] %vm453_vm0, %v492_v45  ;;  %v563_v51 = vmul.f32 %v3076_v14, %v519_v47  ;;  %v640_v52 = vmul.f32 %v3085_v21, %v519_v47  ;;  %v714_v53 = vmul.f32 %v3106_v39, %v518_v46 }
  0x8b   : > { %v734_v54 = vmul.f32 %v3109_v40, %v518_v46  ;;  %v735_v55 = vmul.f32 %v3109_v40, %v519_v47  ;;  %v810_v56 = vmul.f32 %v3112_v41, %v518_v46  ;;  %v811_v57 = vmul.f32 %v3112_v41, %v519_v47  ;;  %v3176_v47 = vld [vmem:[#allocation2 + $0x38] sm:$0x3] }
  0x8c   : > { %v597_v59 = vrot.slane %v563_v51, 1  ;;  %v722_v60 = vadd.f32 %v714_v53, %v702_v42  ;;  %v541_v62 = vmul.f32 %v3088_v22, %v518_v46  ;;  %v674_v4 = vrot.slane %v640_v52, 2 }
  0x8d   : > { %v766_v61 = vrot.slane %v734_v54, 1  ;;  %v496_v63 = vpop.permute.xlu0 %495  ;;  %v498_v1 = vpop.permute.xlu1 %497  ;;  %v3139_v2 = vld [vmem:[#allocation2 + $0x20] sm:$0xff]  ;;  %v3141_v3 = vld [vmem:[#allocation2 + $0x28] sm:$0x3]  ;;  %v767_v5 = vrot.slane %v735_v55, 1  ;;  %v842_v6 = vrot.slane %v810_v56, 2  ;;  %v562_v7 = vmul.f32 %v3076_v14, %v518_v46 }
  0x8e   : > { %514 = vst.msk [vmem:[#allocation2 + $0x71] sm:$0xff] %vm453_vm0, %v496_v63  ;;  %515 = vst.msk [vmem:[#allocation2 + $0x81] sm:$0xff] %vm453_vm0, %v498_v1  ;;  %v3148_v8 = vmul.f32 %v3076_v14, %v3141_v3  ;;  %v843_v9 = vrot.slane %v811_v57, 2  ;;  %v906_v10 = vmul.f32 %v3120_v49, %v3139_v2  ;;  %v639_v11 = vmul.f32 %v3085_v21, %v518_v46  ;;  %v3174_v46 = vld [vmem:[#allocation2 + $0x30] sm:$0xff] }
  0x8f   : > { %v768_v13 = vsel %vm592_vm2, %v766_v61, %v767_v5  ;;  %v907_v16 = vmul.f32 %v3120_v49, %v3141_v3  ;;  %v982_v17 = vmul.f32 %v3123_v50, %v3139_v2  ;;  %v983_v19 = vmul.f32 %v3123_v50, %v3141_v3 }
  0x90   : > { %v798_v20 = vadd.f32 %v768_v13, %v722_v60  ;;  %v844_v23 = vsel %vm669_vm3, %v842_v6, %v843_v9  ;;  %v886_v24 = vmul.f32 %v3117_v48, %v3139_v2  ;;  %v938_v25 = vrot.slane %v906_v10, 1  ;;  %v3189_v60 = vld [vmem:[%s4261_s2] ss:$0 sm:$0xff] }
  0x91   : > { %v939_v26 = vrot.slane %v907_v16, 1  ;;  %v1014_v27 = vrot.slane %v982_v17, 2  ;;  %v1015_v28 = vrot.slane %v983_v19, 2  ;;  %v596_v29 = vrot.slane %v562_v7, 1 }
  0x92   : > { %v600_v30 = vrot.slane %v3148_v8, 1  ;;  %v874_v31 = vadd.f32 %v844_v23, %v798_v20  ;;  %v673_v32 = vrot.slane %v639_v11, 2  ;;  %v736_v33 = vmul.f32 %v3109_v40, %v3139_v2 }
  0x93   : > { %v940_v34 = vsel %vm592_vm2, %v938_v25, %v939_v26  ;;  %v598_v35 = vsel %vm592_vm2, %v596_v29, %v597_v59  ;;  %v715_v36 = vmul.f32 %v3106_v39, %v3139_v2  ;;  %v737_v37 = vmul.f32 %v3109_v40, %v3141_v3 }
  0x94   : > { %v894_v38 = vadd.f32 %v886_v24, %v874_v31  ;;  %v1016_v42 = vsel %vm669_vm3, %v1014_v27, %v1015_v28  ;;  %v626_v44 = vadd.f32 %v598_v35, %v541_v62  ;;  %v675_v45 = vsel %vm669_vm3, %v673_v32, %v674_v4 }
  0x95   : > { %v769_v51 = vrot.slane %v736_v33, 1  ;;  %v770_v52 = vrot.slane %v737_v37, 1  ;;  %v812_v53 = vmul.f32 %v3112_v41, %v3139_v2  ;;  %v813_v54 = vmul.f32 %v3112_v41, %v3141_v3  ;;  %v3219_v37 = vld [vmem:[#allocation2 + $0x40] sm:$0xff] }
  0x96   : > { %v970_v55 = vadd.f32 %v940_v34, %v894_v38  ;;  %v703_v56 = vadd.f32 %v675_v45, %v626_v44  ;;  %v908_v57 = vmul.f32 %v3120_v49, %v3174_v46  ;;  %v909_v59 = vmul.f32 %v3120_v49, %v3176_v47 }
  0x97   : > { %v845_v61 = vrot.slane %v812_v53, 2  ;;  %v846_v62 = vrot.slane %v813_v54, 2  ;;  %v887_v63 = vmul.f32 %v3117_v48, %v3174_v46  ;;  %v984_v1 = vmul.f32 %v3123_v50, %v3174_v46 }
  0x98   : > { %v1046_v4 = vadd.f32 %v1016_v42, %v970_v55  ;;  %v723_v5 = vadd.f32 %v715_v36, %v703_v56  ;;  %v941_v6 = vrot.slane %v908_v57, 1  ;;  %v942_v7 = vrot.slane %v909_v59, 1 }
  0x99   : > { %v771_v8 = vsel %vm592_vm2, %v769_v51, %v770_v52  ;;  %v847_v9 = vsel %vm669_vm3, %v845_v61, %v846_v62  ;;  %v985_v10 = vmul.f32 %v3123_v50, %v3176_v47  ;;  %v1017_v11 = vrot.slane %v984_v1, 2  ;;  %v3225_v52 = vld [vmem:[#allocation2 + $0x48] sm:$0x3] }
  0x9a   : > { %v1060_v13 = vadd.f32 %v3189_v60, %v1046_v4  ;;  %v799_v16 = vadd.f32 %v771_v8, %v723_v5  ;;  %v542_v17 = vmul.f32 %v3088_v22, %v3139_v2  ;;  %v564_v19 = vmul.f32 %v3076_v14, %v3139_v2  ;;  %v3238_v4 = vld [vmem:[#allocation2 + $0x68] sm:$0x3] }
  0x9b   : > { %v943_v20 = vsel %vm592_vm2, %v941_v6, %v942_v7  ;;  %v1018_v23 = vrot.slane %v985_v10, 2  ;;  %v641_v24 = vmul.f32 %v3085_v21, %v3139_v2  ;;  %v642_v25 = vmul.f32 %v3085_v21, %v3141_v3 }
  0x9c   : > { %2849 = vmatprep.mubr.msk.f32.mxu0 %vm453_vm0, %v1060_v13  ;;  %v875_v26 = vadd.f32 %v847_v9, %v799_v16  ;;  %v599_v27 = vrot.slane %v564_v19, 1  ;;  %v738_v28 = vmul.f32 %v3109_v40, %v3174_v46  ;;  %v739_v29 = vmul.f32 %v3109_v40, %v3176_v47  ;;  %v3247_v16 = vld [vmem:[#allocation2 + $0x50] sm:$0xff] }
  0x9d   : > { %v676_v31 = vrot.slane %v641_v24, 2  ;;  %v677_v32 = vrot.slane %v642_v25, 2  ;;  %v716_v33 = vmul.f32 %v3106_v39, %v3174_v46  ;;  %v814_v2 = vmul.f32 %v3112_v41, %v3174_v46 }
  0x9e   : > { %v895_v34 = vadd.f32 %v887_v63, %v875_v26  ;;  %v601_v3 = vsel %vm592_vm2, %v599_v27, %v600_v30  ;;  %v772_v35 = vrot.slane %v738_v28, 1  ;;  %v773_v36 = vrot.slane %v739_v29, 1 }
  0x9f   : > { %v1019_v38 = vsel %vm669_vm3, %v1017_v11, %v1018_v23  ;;  %v627_v42 = vadd.f32 %v601_v3, %v542_v17  ;;  %v678_v44 = vsel %vm669_vm3, %v676_v31, %v677_v32  ;;  %v815_v45 = vmul.f32 %v3112_v41, %v3176_v47 }
  0xa0   : > { %v971_v51 = vadd.f32 %v943_v20, %v895_v34  ;;  %v774_v53 = vsel %vm592_vm2, %v772_v35, %v773_v36  ;;  %v848_v54 = vrot.slane %v814_v2, 2  ;;  %v910_v30 = vmul.f32 %v3120_v49, %v3219_v37  ;;  %v3250_v20 = vld [vmem:[#allocation2 + $0x58] sm:$0x3] }
  0xa1   : > { %v704_v55 = vadd.f32 %v678_v44, %v627_v42  ;;  %v849_v56 = vrot.slane %v815_v45, 2  ;;  %v911_v57 = vmul.f32 %v3120_v49, %v3225_v52  ;;  %v986_v59 = vmul.f32 %v3123_v50, %v3219_v37 }
  0xa2   : > { %v1047_v61 = vadd.f32 %v1019_v38, %v971_v51  ;;  %v888_v62 = vmul.f32 %v3117_v48, %v3219_v37  ;;  %v944_v63 = vrot.slane %v910_v30, 1  ;;  %v987_v1 = vmul.f32 %v3123_v50, %v3225_v52 }
  0xa3   : > { %v724_v5 = vadd.f32 %v716_v33, %v704_v55  ;;  %v945_v6 = vrot.slane %v911_v57, 1  ;;  %v1020_v7 = vrot.slane %v986_v59, 2  ;;  %v544_v8 = vmul.f32 %v3088_v22, %v3219_v37  ;;  %v3276_v55 = vld [vmem:[#allocation2 + $0x60] sm:$0xff] }
  0xa4   : > { %v1061_v9 = vadd.f32 %v3189_v60, %v1047_v61  ;;  %v1021_v10 = vrot.slane %v987_v1, 2  ;;  %v568_v11 = vmul.f32 %v3076_v14, %v3219_v37  ;;  %v569_v13 = vmul.f32 %v3076_v14, %v3225_v52 }
  0xa5   : > { %v800_v17 = vadd.f32 %v774_v53, %v724_v5  ;;  %v850_v19 = vsel %vm669_vm3, %v848_v54, %v849_v56  ;;  %v3254_v23 = vmul.f32 %v3076_v14, %v3238_v4  ;;  %v645_v24 = vmul.f32 %v3085_v21, %v3219_v37 }
  0xa6   : > { %2850 = vmatmul.mubr.msk.f32.vlgmr.msra.gmra.mxu0 %vm453_vm0, %v1061_v9  ;;  %v946_v25 = vsel %vm592_vm2, %v944_v63, %v945_v6  ;;  %v605_v26 = vrot.slane %v568_v11, 1  ;;  %v606_v27 = vrot.slane %v569_v13, 1  ;;  %v646_v28 = vmul.f32 %v3085_v21, %v3225_v52 }
  0xa7   : > { %v876_v29 = vadd.f32 %v850_v19, %v800_v17  ;;  %v1022_v31 = vsel %vm669_vm3, %v1020_v7, %v1021_v10  ;;  %v612_v32 = vrot.slane %v3254_v23, 1  ;;  %v682_v33 = vrot.slane %v645_v24, 2 }
  0xa8   : > { %v607_v2 = vsel %vm592_vm2, %v605_v26, %v606_v27  ;;  %v683_v34 = vrot.slane %v646_v28, 2  ;;  %v742_v3 = vmul.f32 %v3109_v40, %v3247_v16  ;;  %v743_v35 = vmul.f32 %v3109_v40, %v3250_v20 }
  0xa9   : > { %v896_v36 = vadd.f32 %v888_v62, %v876_v29  ;;  %v629_v38 = vadd.f32 %v607_v2, %v544_v8  ;;  %v818_v42 = vmul.f32 %v3112_v41, %v3247_v16  ;;  %v819_v44 = vmul.f32 %v3112_v41, %v3250_v20 }
  0xaa   : > { %v684_v45 = vsel %vm669_vm3, %v682_v33, %v683_v34  ;;  %v718_v51 = vmul.f32 %v3106_v39, %v3247_v16  ;;  %v778_v53 = vrot.slane %v742_v3, 1  ;;  %v779_v54 = vrot.slane %v743_v35, 1 }
  0xab   : > { %v972_v30 = vadd.f32 %v946_v25, %v896_v36  ;;  %v706_v56 = vadd.f32 %v684_v45, %v629_v38  ;;  %v854_v57 = vrot.slane %v818_v42, 2  ;;  %v855_v59 = vrot.slane %v819_v44, 2 }
  0xac   : > { %v780_v61 = vsel %vm592_vm2, %v778_v53, %v779_v54  ;;  %v914_v62 = vmul.f32 %v3120_v49, %v3276_v55  ;;  %v915_v63 = vmul.f32 %v3120_v49, %v3238_v4  ;;  %v990_v1 = vmul.f32 %v3123_v50, %v3276_v55 }
  0xad   : > { %v1048_v5 = vadd.f32 %v1022_v31, %v972_v30  ;;  %v726_v6 = vadd.f32 %v718_v51, %v706_v56  ;;  %v890_v7 = vmul.f32 %v3117_v48, %v3276_v55  ;;  %v991_v8 = vmul.f32 %v3123_v50, %v3238_v4 }
  0xae   : > { %v856_v9 = vsel %vm669_vm3, %v854_v57, %v855_v59  ;;  %v950_v10 = vrot.slane %v914_v62, 1  ;;  %v951_v11 = vrot.slane %v915_v63, 1  ;;  %v1026_v13 = vrot.slane %v990_v1, 2 }
  0xaf   : > { %v1062_v17 = vadd.f32 %v3189_v60, %v1048_v5  ;;  %v802_v19 = vadd.f32 %v780_v61, %v726_v6  ;;  %v1027_v24 = vrot.slane %v991_v8, 2  ;;  %v566_v25 = vmul.f32 %v3076_v14, %v3174_v46 }
  0xb0   : > { %v543_v26 = vmul.f32 %v3088_v22, %v3174_v46  ;;  %v567_v27 = vmul.f32 %v3076_v14, %v3176_v47  ;;  %v643_v28 = vmul.f32 %v3085_v21, %v3174_v46  ;;  %v644_v29 = vmul.f32 %v3085_v21, %v3176_v47 }
  0xb1   : > { %2852 = vmatprep.mubr.msk.f32.mxu0 %vm453_vm0, %v1062_v17  ;;  %v878_v31 = vadd.f32 %v856_v9, %v802_v19  ;;  %v952_v33 = vsel %vm592_vm2, %v950_v10, %v951_v11  ;;  %v1028_v2 = vsel %vm669_vm3, %v1026_v13, %v1027_v24  ;;  %v602_v34 = vrot.slane %v566_v25, 1 }
  0xb2   : > { %v603_v3 = vrot.slane %v567_v27, 1  ;;  %v679_v35 = vrot.slane %v643_v28, 2  ;;  %v680_v36 = vrot.slane %v644_v29, 2  ;;  %v740_v38 = vmul.f32 %v3109_v40, %v3219_v37 }
  0xb3   : > { %v898_v42 = vadd.f32 %v890_v7, %v878_v31  ;;  %v741_v46 = vmul.f32 %v3109_v40, %v3225_v52  ;;  %v816_v47 = vmul.f32 %v3112_v41, %v3219_v37  ;;  %v817_v44 = vmul.f32 %v3112_v41, %v3225_v52 }
  0xb4   : > { %v604_v45 = vsel %vm592_vm2, %v602_v34, %v603_v3  ;;  %v681_v51 = vsel %vm669_vm3, %v679_v35, %v680_v36  ;;  %v717_v53 = vmul.f32 %v3106_v39, %v3219_v37  ;;  %v775_v54 = vrot.slane %v740_v38, 1  ;;  %v3344_v36 = vld [vmem:[#allocation2 + $0x70] sm:$0xff] }
  0xb5   : > { %v974_v30 = vadd.f32 %v952_v33, %v898_v42  ;;  %v628_v56 = vadd.f32 %v604_v45, %v543_v26  ;;  %v776_v57 = vrot.slane %v741_v46, 1  ;;  %v851_v59 = vrot.slane %v816_v47, 2 }
  0xb6   : > { %v852_v61 = vrot.slane %v817_v44, 2  ;;  %v912_v62 = vmul.f32 %v3120_v49, %v3247_v16  ;;  %v913_v63 = vmul.f32 %v3120_v49, %v3250_v20  ;;  %v988_v52 = vmul.f32 %v3123_v50, %v3247_v16 }
  0xb7   : > { %v1050_v1 = vadd.f32 %v1028_v2, %v974_v30  ;;  %v705_v5 = vadd.f32 %v681_v51, %v628_v56  ;;  %v889_v37 = vmul.f32 %v3117_v48, %v3247_v16  ;;  %v989_v6 = vmul.f32 %v3123_v50, %v3250_v20 }
  0xb8   : > { %v777_v7 = vsel %vm592_vm2, %v775_v54, %v776_v57  ;;  %v947_v8 = vrot.slane %v912_v62, 1  ;;  %v948_v9 = vrot.slane %v913_v63, 1  ;;  %v1023_v10 = vrot.slane %v988_v52, 2 }
  0xb9   : > { %v1064_v11 = vadd.f32 %v3189_v60, %v1050_v1  ;;  %v725_v13 = vadd.f32 %v717_v53, %v705_v5  ;;  %v853_v17 = vsel %vm669_vm3, %v851_v59, %v852_v61  ;;  %v1024_v19 = vrot.slane %v989_v6, 2 }
  0xba   : > { %v545_v24 = vmul.f32 %v3088_v22, %v3247_v16  ;;  %v570_v25 = vmul.f32 %v3076_v14, %v3247_v16  ;;  %v571_v26 = vmul.f32 %v3076_v14, %v3250_v20  ;;  %v647_v27 = vmul.f32 %v3085_v21, %v3247_v16  ;;  %v3346_v16 = vld [vmem:[#allocation2 + $0x78] sm:$0x3] }
  0xbb   : > { %2855 = vmatprep.mubr.msk.f32.mxu1 %vm453_vm0, %v1064_v11  ;;  %v801_v28 = vadd.f32 %v777_v7, %v725_v13  ;;  %v949_v29 = vsel %vm592_vm2, %v947_v8, %v948_v9  ;;  %v1025_v31 = vsel %vm669_vm3, %v1023_v10, %v1024_v19  ;;  %v648_v33 = vmul.f32 %v3085_v21, %v3250_v20 }
  0xbc   : > { %v608_v2 = vrot.slane %v570_v25, 1  ;;  %v609_v34 = vrot.slane %v571_v26, 1  ;;  %v685_v3 = vrot.slane %v647_v27, 2  ;;  %v744_v35 = vmul.f32 %v3109_v40, %v3276_v55 }
  0xbd   : > { %v877_v38 = vadd.f32 %v853_v17, %v801_v28  ;;  %v686_v42 = vrot.slane %v648_v33, 2  ;;  %v745_v46 = vmul.f32 %v3109_v40, %v3238_v4  ;;  %v820_v47 = vmul.f32 %v3112_v41, %v3276_v55 }
  0xbe   : > { %v610_v20 = vsel %vm592_vm2, %v608_v2, %v609_v34  ;;  %v719_v44 = vmul.f32 %v3106_v39, %v3276_v55  ;;  %v781_v45 = vrot.slane %v744_v35, 1  ;;  %v821_v51 = vmul.f32 %v3112_v41, %v3238_v4  ;;  %v533_v35 = vld [vmem:[#allocation2 + $0x88] sm:$0x3] }
  0xbf   : > { %v897_v53 = vadd.f32 %v889_v37, %v877_v38  ;;  %v630_v54 = vadd.f32 %v610_v20, %v545_v24  ;;  %v687_v30 = vsel %vm669_vm3, %v685_v3, %v686_v42  ;;  %v782_v56 = vrot.slane %v745_v46, 1 }
  0xc0   : > { %v857_v57 = vrot.slane %v820_v47, 2  ;;  %v858_v59 = vrot.slane %v821_v51, 2  ;;  %v916_v61 = vmul.f32 %v3120_v49, %v3344_v36  ;;  %v917_v62 = vmul.f32 %v3120_v49, %v3346_v16 }
  0xc1   : > { %v973_v63 = vadd.f32 %v949_v29, %v897_v53  ;;  %v707_v52 = vadd.f32 %v687_v30, %v630_v54  ;;  %v891_v1 = vmul.f32 %v3117_v48, %v3344_v36  ;;  %v992_v5 = vmul.f32 %v3123_v50, %v3344_v36 }
  0xc2   : > { %v783_v37 = vsel %vm592_vm2, %v781_v45, %v782_v56  ;;  %v953_v6 = vrot.slane %v916_v61, 1  ;;  %v954_v7 = vrot.slane %v917_v62, 1  ;;  %v993_v8 = vmul.f32 %v3123_v50, %v3346_v16 }
  0xc3   : > { %v1049_v9 = vadd.f32 %v1025_v31, %v973_v63  ;;  %v727_v10 = vadd.f32 %v719_v44, %v707_v52  ;;  %v859_v11 = vsel %vm669_vm3, %v857_v57, %v858_v59  ;;  %v1029_v13 = vrot.slane %v992_v5, 2 }
  0xc4   : > { %v1030_v17 = vrot.slane %v993_v8, 2  ;;  %v546_v19 = vmul.f32 %v3088_v22, %v3276_v55  ;;  %v572_v24 = vmul.f32 %v3076_v14, %v3276_v55  ;;  %v649_v25 = vmul.f32 %v3085_v21, %v3276_v55  ;;  %v532_v55 = vld [vmem:[#allocation2 + $0x80] sm:$0xff] }
  0xc5   : > { %v1063_v26 = vadd.f32 %v3189_v60, %v1049_v9  ;;  %v803_v27 = vadd.f32 %v783_v37, %v727_v10  ;;  %v955_v28 = vsel %vm592_vm2, %v953_v6, %v954_v7  ;;  %v650_v29 = vmul.f32 %v3085_v21, %v3238_v4 }
  0xc6   : > { %v611_v31 = vrot.slane %v572_v24, 1  ;;  %v688_v33 = vrot.slane %v649_v25, 2  ;;  %v720_v2 = vmul.f32 %v3106_v39, %v3344_v36  ;;  %v746_v34 = vmul.f32 %v3109_v40, %v3344_v36 }
  0xc7   : > { %2853 = vmatmul.mubr.msk.f32.gmra.mxu0 %vm453_vm0, %v1063_v26  ;;  %v879_v3 = vadd.f32 %v859_v11, %v803_v27  ;;  %v689_v38 = vrot.slane %v650_v29, 2  ;;  %v747_v42 = vmul.f32 %v3109_v40, %v3346_v16  ;;  %v822_v4 = vmul.f32 %v3112_v41, %v3344_v36 }
  0xc8   : > { %v1031_v46 = vsel %vm669_vm3, %v1029_v13, %v1030_v17  ;;  %v613_v47 = vsel %vm592_vm2, %v611_v31, %v612_v32  ;;  %v784_v20 = vrot.slane %v746_v34, 1  ;;  %v823_v44 = vmul.f32 %v3112_v41, %v3346_v16  ;;  %v535_v31 = vld [vmem:[#allocation2 + $0x98] sm:$0x3] }
  0xc9   : > { %v899_v45 = vadd.f32 %v891_v1, %v879_v3  ;;  %v631_v51 = vadd.f32 %v613_v47, %v546_v19  ;;  %v690_v53 = vsel %vm669_vm3, %v688_v33, %v689_v38  ;;  %v785_v54 = vrot.slane %v747_v42, 1 }
  0xca   : > { %v860_v30 = vrot.slane %v822_v4, 2  ;;  %v861_v56 = vrot.slane %v823_v44, 2  ;;  %v918_v57 = vmul.f32 %v3120_v49, %v532_v55  ;;  %v919_v59 = vmul.f32 %v3120_v49, %v533_v35 }
  0xcb   : > { %v975_v61 = vadd.f32 %v955_v28, %v899_v45  ;;  %v708_v62 = vadd.f32 %v690_v53, %v631_v51  ;;  %v892_v23 = vmul.f32 %v3117_v48, %v532_v55  ;;  %v994_v32 = vmul.f32 %v3123_v50, %v532_v55 }
  0xcc   : > { %v786_v63 = vsel %vm592_vm2, %v784_v20, %v785_v54  ;;  %v956_v52 = vrot.slane %v918_v57, 1  ;;  %v957_v1 = vrot.slane %v919_v59, 1  ;;  %v995_v5 = vmul.f32 %v3123_v50, %v533_v35 }
  0xcd   : > { %v1051_v37 = vadd.f32 %v1031_v46, %v975_v61  ;;  %v728_v6 = vadd.f32 %v720_v2, %v708_v62  ;;  %v862_v7 = vsel %vm669_vm3, %v860_v30, %v861_v56  ;;  %v1032_v8 = vrot.slane %v994_v32, 2 }
  0xce   : > { %v958_v9 = vsel %vm592_vm2, %v956_v52, %v957_v1  ;;  %v547_v10 = vmul.f32 %v3088_v22, %v3344_v36  ;;  %v574_v11 = vmul.f32 %v3076_v14, %v3344_v36  ;;  %v575_v13 = vmul.f32 %v3076_v14, %v3346_v16 }
  0xcf   : > { %v1065_v17 = vadd.f32 %v3189_v60, %v1051_v37  ;;  %v804_v19 = vadd.f32 %v786_v63, %v728_v6  ;;  %v651_v24 = vmul.f32 %v3085_v21, %v3344_v36  ;;  %v652_v25 = vmul.f32 %v3085_v21, %v3346_v16  ;;  %v1249_v37 = vld [vmem:[#allocation3 + $0x8] sm:$0x3] }
  0xd0   : > { %v1033_v26 = vrot.slane %v995_v5, 2  ;;  %v614_v27 = vrot.slane %v574_v11, 1  ;;  %v615_v28 = vrot.slane %v575_v13, 1  ;;  %v721_v22 = vmul.f32 %v3106_v39, %v532_v55  ;;  %v1248_v5 = vld [vmem:[#allocation3] sm:$0xff]  ;;  %1949 = vst.msk [vmem:[#allocation3 + $0x8] sm:$0x3] %vm1219_vm5, %v2922_v0 }
  0xd1   : > { %2856 = vmatmul.mubr.msk.f32.vlgmr.msra.gmra.mxu1 %vm453_vm0, %v1065_v17  ;;  %v880_v29 = vadd.f32 %v862_v7, %v804_v19  ;;  %v691_v33 = vrot.slane %v651_v24, 2  ;;  %v692_v14 = vrot.slane %v652_v25, 2  ;;  %v748_v2 = vmul.f32 %v3109_v40, %v532_v55  ;;  %1948 = vst.msk [vmem:[#allocation3] sm:$0xff] %vm1217_vm4, %v2922_v0 }
  0xd2   : > { %v616_v34 = vsel %vm592_vm2, %v614_v27, %v615_v28  ;;  %v749_v36 = vmul.f32 %v3109_v40, %v533_v35  ;;  %v824_v3 = vmul.f32 %v3112_v41, %v532_v55  ;;  %v825_v21 = vmul.f32 %v3112_v41, %v533_v35 }
  0xd3   : > { %v900_v16 = vadd.f32 %v892_v23, %v880_v29  ;;  %v632_v38 = vadd.f32 %v616_v34, %v547_v10  ;;  %v693_v39 = vsel %vm669_vm3, %v691_v33, %v692_v14  ;;  %v787_v42 = vrot.slane %v748_v2, 1  ;;  %v1798_v29 = vld [vmem:[%s4266_s7] sm:$0xff]  ;;  %v3511_v33 = vld [vmem:[#allocation3 + $0x90] sm:$0xff]  ;;  %v1267_v14 = vld [vmem:[#allocation3 + $0x98] sm:$0x3] }
  0xd4   : > { %v788_v4 = vrot.slane %v749_v36, 1  ;;  %v863_v46 = vrot.slane %v824_v3, 2  ;;  %v864_v47 = vrot.slane %v825_v21, 2  ;;  %v921_v20 = vmul.f32 %v3120_v49, %v535_v31  ;;  %1966 = vst.msk [vmem:[#allocation3 + $0x90] sm:$0xff] %vm1217_vm4, %v2922_v0 }
  0xd5   : > { %v976_v44 = vadd.f32 %v958_v9, %v900_v16  ;;  %v709_v45 = vadd.f32 %v693_v39, %v632_v38  ;;  %v1034_v51 = vsel %vm669_vm3, %v1032_v8, %v1033_v26  ;;  %v996_v55 = vmul.f32 %v3123_v50, %v3114_v43  ;;  %1967 = vst.msk [vmem:[#allocation3 + $0x98] sm:$0x3] %vm1219_vm5, %v2922_v0 }
  0xd6   : > { %v789_v40 = vsel %vm592_vm2, %v787_v42, %v788_v4  ;;  %v997_v41 = vmul.f32 %v3123_v50, %v535_v31  ;;  %v865_v54 = vsel %vm669_vm3, %v863_v46, %v864_v47  ;;  %v959_v30 = vrot.slane %v3136_v58, 1  ;;  %v1215_v31 = vld [vmem:[%s4264_s5 + $0x8] sm:$0x7] }
  0xd7   : > { %v1052_v35 = vadd.f32 %v1034_v51, %v976_v44  ;;  %v729_v53 = vadd.f32 %v721_v22, %v709_v45  ;;  %v960_v56 = vrot.slane %v921_v20, 1  ;;  %v893_v59 = vmul.f32 %v3117_v48, %v3114_v43  ;;  %v1213_v43 = vld [vmem:[%s4264_s5] sm:$0x7]  ;;  %v1799_v22 = vld [vmem:[%s4266_s7 + $0x8] sm:$0xff] }
  0xd8   : > { %v1035_v61 = vrot.slane %v996_v55, 2  ;;  %v1036_v62 = vrot.slane %v997_v41, 2  ;;  %v3483_v48 = vrot.slane %v1213_v43, %v3070_v12  ;;  %v3495_v8 = vrot.slane %v1213_v43, %v3080_v18  ;;  %2861 = vmatprep.subr.mxu1 %v1799_v22  ;;  %v3538_v20 = vld [vmem:[%s4263_s4] ss:$0 sm:$0xff] }
  0xd9   : > { %v1066_v49 = vadd.f32 %v3189_v60, %v1052_v35  ;;  %v805_v57 = vadd.f32 %v789_v40, %v729_v53  ;;  %v961_v50 = vsel %vm592_vm2, %v959_v30, %v960_v56  ;;  %2862 = vmatpush3.msra.mxu1 %v1799_v22  ;;  %v3518_v2 = vrot.slane %v1215_v31, %v3070_v12  ;;  %v1214_v35 = vld [vmem:[%s4264_s5 + $0x4] sm:$0x7] }
  0xda   : > { %v1037_v63 = vsel %vm669_vm3, %v1035_v61, %v1036_v62  ;;  %v1292_v6 = vmul.f32 %v3483_v48, %v1248_v5  ;;  %v1293_v7 = vmul.f32 %v3483_v48, %v1249_v37  ;;  %v1272_v17 = vmul.f32 %v3495_v8, %v1248_v5  ;;  %2863 = vmatprep.subr.mxu1 %v1798_v29 }
  0xdb   : > { %2858 = vmatprep.mubr.msk.f32.mxu1 %vm453_vm0, %v1066_v49  ;;  %v881_v23 = vadd.f32 %v865_v54, %v805_v57  ;;  %2864 = vmatpush3.msra.mxu1 %v1798_v29  ;;  %v3521_v34 = vrot.slane %v1215_v31, %v3078_v15  ;;  %v1650_v36 = vmul.f32 %v3518_v2, %v3511_v33 }
  0xdc   : > { %v1324_v9 = vrot.slane %v1292_v6, 1  ;;  %v1325_v10 = vrot.slane %v1293_v7, 1  ;;  %v1651_v3 = vmul.f32 %v3518_v2, %v1267_v14  ;;  %v3556_v30 = vrot.slane %v1214_v35, %v3080_v18 }
  0xdd   : > { %v901_v32 = vadd.f32 %v893_v59, %v881_v23  ;;  %v1689_v21 = vrot.slane %v1650_v36, 1  ;;  %v1726_v38 = vmul.f32 %v3521_v34, %v3511_v33  ;;  %v1727_v39 = vmul.f32 %v3521_v34, %v1267_v14 }
  0xde   : > { %v1326_v19 = vsel %vm592_vm2, %v1324_v9, %v1325_v10  ;;  %v1690_v16 = vrot.slane %v1651_v3, 1  ;;  %v3559_v56 = vrot.slane %v1214_v35, %v3070_v12  ;;  %v3562_v59 = vrot.slane %v1214_v35, %v3078_v15 }
  0xdf   : > { %v977_v52 = vadd.f32 %v961_v50, %v901_v32  ;;  %v1356_v26 = vadd.f32 %v1326_v19, %v1272_v17  ;;  %v1765_v4 = vrot.slane %v1726_v38, 2  ;;  %v1766_v46 = vrot.slane %v1727_v39, 2  ;;  %v3597_v39 = vld [vmem:[%s4265_s6] ss:$0 sm:$0xff] }
  0xe0   : > { %v3530_v42 = vsel %vm592_vm2, %v1689_v21, %v1690_v16  ;;  %v3579_v7 = vrot.slane %v1215_v31, %v3080_v18 }
  0xe1   : > { %v1053_v1 = vadd.f32 %v1037_v63, %v977_v52  ;;  %v3533_v47 = vsel %vm669_vm3, %v1765_v4, %v1766_v46 }
  0xe3   : > { %v1067_v58 = vadd.f32 %v3189_v60, %v1053_v1  ;;  %v3486_v60 = vrot.slane %v1213_v43, %v3078_v15 }
  0xe5   : > { %2859 = vmatmul.mubr.msk.f32.gmra.mxu1 %vm453_vm0, %v1067_v58  ;;  %v1368_v11 = vmul.f32 %v3486_v60, %v1248_v5  ;;  %v1369_v13 = vmul.f32 %v3486_v60, %v1249_v37 }
  0xe7   : > { %v1400_v24 = vrot.slane %v1368_v11, 2  ;;  %v1401_v25 = vrot.slane %v1369_v13, 2 }
  0xe9   : > { %v1402_v27 = vsel %vm669_vm3, %v1400_v24, %v1401_v25 }
  0xea   : > { %v1432_v28 = vadd.f32 %v1402_v27, %v1356_v26 }
 0x166   : > { %v2851_v44 = vpop.f32.mrf.mxu0 }
 0x167   : > { %v1172_v45 = vadd.f32 %v2851_v44, %v3538_v20 }
 0x168   : > { %v1166_v51 = vpop.f32.mrf.mxu0 }
 0x169   : > { %v1206_v40 = vmax.f32 %v1172_v45, 0.0  ;;  %v1167_v55 = vadd.f32 %v3538_v20, %v1166_v51 }
 0x16b   : > { %1241 = vst.msk [vmem:[#allocation3 + $0x21] sm:$0xff] %vm1217_vm4, %v1206_v40  ;;  %v1205_v41 = vmax.f32 %v1167_v55, 0.0 }
 0x16d   : > { %1240 = vst.msk [vmem:[#allocation3 + $0x11] sm:$0xff] %vm1217_vm4, %v1205_v41 }
 0x172   : > { %v3547_v53 = vld [vmem:[#allocation3 + $0x20] sm:$0xff]  ;;  %v3549_v54 = vld [vmem:[#allocation3 + $0x28] sm:$0x3] }
 0x173   : > { %1952 = vst.msk [vmem:[#allocation3 + $0x20] sm:$0xff] %vm1217_vm4, %v2922_v0  ;;  %v1636_v1 = vmul.f32 %v3518_v2, %v3547_v53  ;;  %v1637_v37 = vmul.f32 %v3518_v2, %v3549_v54  ;;  %v1712_v11 = vmul.f32 %v3521_v34, %v3547_v53  ;;  %v1713_v13 = vmul.f32 %v3521_v34, %v3549_v54 }
 0x174   : > { %1953 = vst.msk [vmem:[#allocation3 + $0x28] sm:$0x3] %vm1219_vm5, %v2922_v0  ;;  %v1250_v49 = vld [vmem:[#allocation3 + $0x10] sm:$0xff]  ;;  %v1251_v57 = vld [vmem:[#allocation3 + $0x18] sm:$0x3]  ;;  %v1296_v41 = vmul.f32 %v3483_v48, %v3547_v53  ;;  %v1297_v35 = vmul.f32 %v3483_v48, %v3549_v54 }
 0x175   : > { %1950 = vst.msk [vmem:[#allocation3 + $0x10] sm:$0xff] %vm1217_vm4, %v2922_v0  ;;  %v1444_v61 = vmul.f32 %v3556_v30, %v1250_v49  ;;  %v1464_v62 = vmul.f32 %v3559_v56, %v1250_v49  ;;  %v1465_v23 = vmul.f32 %v3559_v56, %v1251_v57  ;;  %v1540_v50 = vmul.f32 %v3562_v59, %v1250_v49 }
 0x176   : > { %1951 = vst.msk [vmem:[#allocation3 + $0x18] sm:$0x3] %vm1219_vm5, %v2922_v0  ;;  %v1541_v32 = vmul.f32 %v3562_v59, %v1251_v57  ;;  %v1295_v6 = vmul.f32 %v3483_v48, %v1251_v57  ;;  %v1294_v9 = vmul.f32 %v3483_v48, %v1250_v49  ;;  %v1668_v24 = vrot.slane %v1636_v1, 1 }
 0x177   : > { %v1452_v63 = vadd.f32 %v1444_v61, %v1432_v28  ;;  %v1496_v52 = vrot.slane %v1464_v62, 1  ;;  %v1497_v58 = vrot.slane %v1465_v23, 1  ;;  %v1572_v43 = vrot.slane %v1540_v50, 2 }
 0x178   : > { %v1573_v5 = vrot.slane %v1541_v32, 2  ;;  %v1669_v25 = vrot.slane %v1637_v37, 1  ;;  %v1328_v26 = vrot.slane %v1295_v6, 1  ;;  %v1616_v28 = vmul.f32 %v3579_v7, %v3547_v53 }
 0x179   : > { %v1498_v10 = vsel %vm592_vm2, %v1496_v52, %v1497_v58  ;;  %v1327_v22 = vrot.slane %v1294_v9, 1  ;;  %v1744_v29 = vrot.slane %v1712_v11, 2  ;;  %v1745_v31 = vrot.slane %v1713_v13, 2 }
 0x17a   : > { %v1528_v17 = vadd.f32 %v1498_v10, %v1452_v63  ;;  %v1574_v19 = vsel %vm669_vm3, %v1572_v43, %v1573_v5  ;;  %v1371_v14 = vmul.f32 %v3486_v60, %v1251_v57  ;;  %v1370_v3 = vmul.f32 %v3486_v60, %v1250_v49 }
 0x17b   : > { %v1670_v21 = vsel %vm592_vm2, %v1668_v24, %v1669_v25  ;;  %v1329_v38 = vsel %vm592_vm2, %v1327_v22, %v1328_v26  ;;  %v1746_v4 = vsel %vm669_vm3, %v1744_v29, %v1745_v31  ;;  %v1273_v46 = vmul.f32 %v3495_v8, %v1250_v49 }
 0x17c   : > { %v1604_v27 = vadd.f32 %v1574_v19, %v1528_v17  ;;  %v1404_v44 = vrot.slane %v1371_v14, 2  ;;  %v1403_v51 = vrot.slane %v1370_v3, 2  ;;  %v1466_v57 = vmul.f32 %v3559_v56, %v3547_v53 }
 0x17d   : > { %v1357_v40 = vadd.f32 %v1329_v38, %v1273_v46  ;;  %v1467_v61 = vmul.f32 %v3559_v56, %v3549_v54  ;;  %v1445_v63 = vmul.f32 %v3556_v30, %v3547_v53  ;;  %v1330_v52 = vrot.slane %v1296_v41, 1 }
 0x17e   : > { %v1624_v36 = vadd.f32 %v1616_v28, %v1604_v27  ;;  %v1405_v49 = vsel %vm669_vm3, %v1403_v51, %v1404_v44  ;;  %v1331_v1 = vrot.slane %v1297_v35, 1  ;;  %v1499_v5 = vrot.slane %v1466_v57, 1 }
 0x17f   : > { %v1433_v50 = vadd.f32 %v1405_v49, %v1357_v40  ;;  %v1500_v37 = vrot.slane %v1467_v61, 1  ;;  %v1542_v6 = vmul.f32 %v3562_v59, %v3547_v53  ;;  %v1543_v9 = vmul.f32 %v3562_v59, %v3549_v54 }
 0x180   : > { %v1700_v16 = vadd.f32 %v1670_v21, %v1624_v36  ;;  %v1372_v10 = vmul.f32 %v3486_v60, %v3547_v53  ;;  %v1373_v11 = vmul.f32 %v3486_v60, %v3549_v54  ;;  %v1332_v19 = vsel %vm592_vm2, %v1330_v52, %v1331_v1 }
 0x181   : > { %v1453_v17 = vadd.f32 %v1445_v63, %v1433_v50  ;;  %v1501_v24 = vsel %vm592_vm2, %v1499_v5, %v1500_v37  ;;  %v1274_v25 = vmul.f32 %v3495_v8, %v3547_v53  ;;  %v1575_v26 = vrot.slane %v1542_v6, 2 }
 0x182   : > { %v1776_v45 = vadd.f32 %v1746_v4, %v1700_v16  ;;  %v1576_v27 = vrot.slane %v1543_v9, 2  ;;  %v1406_v28 = vrot.slane %v1372_v10, 2  ;;  %v1407_v22 = vrot.slane %v1373_v11, 2 }
 0x183   : > { %v1529_v29 = vadd.f32 %v1501_v24, %v1453_v17  ;;  %v1358_v31 = vadd.f32 %v1332_v19, %v1274_v25 }
 0x184   : > { %v1790_v55 = vadd.f32 %v3597_v39, %v1776_v45  ;;  %v1577_v16 = vsel %vm669_vm3, %v1575_v26, %v1576_v27  ;;  %v1408_v38 = vsel %vm669_vm3, %v1406_v28, %v1407_v22 }
 0x185   : > { %v1605_v46 = vadd.f32 %v1577_v16, %v1529_v29  ;;  %v1434_v44 = vadd.f32 %v1408_v38, %v1358_v31 }
 0x186   : > { %2865 = vmatprep.mubr.msk.f32.mxu1 %vm1217_vm4, %v1790_v55 }
 0x187   : > { %v2854_v62 = vpop.f32.mrf.mxu0 }
 0x188   : > { %v1182_v23 = vadd.f32 %v2854_v62, %v3538_v20 }
 0x189   : > { %v1176_v32 = vpop.f32.mrf.mxu0 }
 0x18a   : > { %v1208_v58 = vmax.f32 %v1182_v23, 0.0  ;;  %v1177_v43 = vadd.f32 %v3538_v20, %v1176_v32 }
 0x18c   : > { %1243 = vst.msk [vmem:[#allocation3 + $0x41] sm:$0xff] %vm1217_vm4, %v1208_v58  ;;  %v1207_v13 = vmax.f32 %v1177_v43, 0.0 }
 0x18e   : > { %1242 = vst.msk [vmem:[#allocation3 + $0x31] sm:$0xff] %vm1217_vm4, %v1207_v13 }
 0x191   : > { %v2857_v54 = vpop.f32.mrf.mxu1 }
 0x192   : > { %v1192_v14 = vadd.f32 %v2857_v54, %v3538_v20 }
 0x193   : > { %v3631_v36 = vld [vmem:[#allocation3 + $0x40] sm:$0xff]  ;;  %v3633_v3 = vld [vmem:[#allocation3 + $0x48] sm:$0x3]  ;;  %v1186_v21 = vpop.f32.mrf.mxu1 }
 0x194   : > { %1956 = vst.msk [vmem:[#allocation3 + $0x40] sm:$0xff] %vm1217_vm4, %v2922_v0  ;;  %v1210_v53 = vmax.f32 %v1192_v14, 0.0  ;;  %v1187_v4 = vadd.f32 %v3538_v20, %v1186_v21  ;;  %v1640_v40 = vmul.f32 %v3518_v2, %v3631_v36  ;;  %v1641_v55 = vmul.f32 %v3518_v2, %v3633_v3 }
 0x195   : > { %1957 = vst.msk [vmem:[#allocation3 + $0x48] sm:$0x3] %vm1219_vm5, %v2922_v0  ;;  %v1254_v45 = vld [vmem:[#allocation3 + $0x30] sm:$0xff]  ;;  %v1255_v51 = vld [vmem:[#allocation3 + $0x38] sm:$0x3]  ;;  %v3648_v41 = vmul.f32 %v3521_v34, %v3631_v36  ;;  %v3652_v35 = vmul.f32 %v3521_v34, %v3633_v3  ;;  %v1618_v24 = vmul.f32 %v3579_v7, %v3631_v36 }
 0x196   : > { %1954 = vst.msk [vmem:[#allocation3 + $0x30] sm:$0xff] %vm1217_vm4, %v2922_v0  ;;  %1245 = vst.msk [vmem:[#allocation3 + $0x61] sm:$0xff] %vm1217_vm4, %v1210_v53  ;;  %v1209_v57 = vmax.f32 %v1187_v4, 0.0  ;;  %v1617_v61 = vmul.f32 %v3579_v7, %v1254_v45  ;;  %v1638_v62 = vmul.f32 %v3518_v2, %v1254_v45  ;;  %v1639_v49 = vmul.f32 %v3518_v2, %v1255_v51 }
 0x197   : > { %1955 = vst.msk [vmem:[#allocation3 + $0x38] sm:$0x3] %vm1219_vm5, %v2922_v0  ;;  %v1714_v23 = vmul.f32 %v3521_v34, %v1254_v45  ;;  %v1715_v50 = vmul.f32 %v3521_v34, %v1255_v51  ;;  %v1446_v32 = vmul.f32 %v3556_v30, %v1254_v45  ;;  %v1468_v63 = vmul.f32 %v3559_v56, %v1254_v45 }
 0x198   : > { %1244 = vst.msk [vmem:[#allocation3 + $0x51] sm:$0xff] %vm1217_vm4, %v1209_v57  ;;  %v1625_v52 = vadd.f32 %v1617_v61, %v1605_v46  ;;  %v1671_v1 = vrot.slane %v1638_v62, 1  ;;  %v1672_v58 = vrot.slane %v1639_v49, 1  ;;  %v1469_v43 = vmul.f32 %v3559_v56, %v1255_v51 }
 0x199   : > { %v1747_v5 = vrot.slane %v1714_v23, 2  ;;  %v1748_v37 = vrot.slane %v1715_v50, 2  ;;  %v1454_v6 = vadd.f32 %v1446_v32, %v1434_v44  ;;  %v1502_v9 = vrot.slane %v1468_v63, 1 }
 0x19a   : > { %v1673_v10 = vsel %vm592_vm2, %v1671_v1, %v1672_v58  ;;  %v1503_v11 = vrot.slane %v1469_v43, 1  ;;  %v1544_v13 = vmul.f32 %v3562_v59, %v1254_v45  ;;  %v1545_v17 = vmul.f32 %v3562_v59, %v1255_v51 }
 0x19b   : > { %v1701_v19 = vadd.f32 %v1673_v10, %v1625_v52  ;;  %v1674_v25 = vrot.slane %v1640_v40, 1  ;;  %v1675_v26 = vrot.slane %v1641_v55, 1  ;;  %v1749_v27 = vsel %vm669_vm3, %v1747_v5, %v1748_v37 }
 0x19c   : > { %v1504_v28 = vsel %vm592_vm2, %v1502_v9, %v1503_v11  ;;  %v1578_v22 = vrot.slane %v1544_v13, 2  ;;  %v1579_v29 = vrot.slane %v1545_v17, 2  ;;  %v1750_v38 = vrot.slane %v3648_v41, 2 }
 0x19d   : > { %v3675_v31 = vld [vmem:[#allocation3 + $0x60] sm:$0xff]  ;;  %v3677_v54 = vld [vmem:[#allocation3 + $0x68] sm:$0x3]  ;;  %v1777_v14 = vadd.f32 %v1749_v27, %v1701_v19  ;;  %v1530_v21 = vadd.f32 %v1504_v28, %v1454_v6  ;;  %v1676_v16 = vsel %vm592_vm2, %v1674_v25, %v1675_v26  ;;  %v1751_v4 = vrot.slane %v3652_v35, 2 }
 0x19e   : > { %1960 = vst.msk [vmem:[#allocation3 + $0x60] sm:$0xff] %vm1217_vm4, %v2922_v0  ;;  %v1580_v53 = vsel %vm669_vm3, %v1578_v22, %v1579_v29  ;;  %v1298_v46 = vmul.f32 %v3483_v48, %v1254_v45  ;;  %v1299_v44 = vmul.f32 %v3483_v48, %v1255_v51  ;;  %v1275_v61 = vmul.f32 %v3495_v8, %v1254_v45 }
 0x19f   : > { %1961 = vst.msk [vmem:[#allocation3 + $0x68] sm:$0x3] %vm1219_vm5, %v2922_v0  ;;  %v3689_v40 = vld [vmem:[#allocation3 + $0x50] sm:$0xff]  ;;  %v3691_v55 = vld [vmem:[#allocation3 + $0x58] sm:$0x3]  ;;  %v1791_v41 = vadd.f32 %v3597_v39, %v1777_v14  ;;  %v1606_v57 = vadd.f32 %v1580_v53, %v1530_v21  ;;  %v1374_v62 = vmul.f32 %v3486_v60, %v1254_v45  ;;  %v1375_v23 = vmul.f32 %v3486_v60, %v1255_v51 }
 0x1a0   : > { %1958 = vst.msk [vmem:[#allocation3 + $0x50] sm:$0xff] %vm1217_vm4, %v2922_v0  ;;  %v1333_v35 = vrot.slane %v1298_v46, 1  ;;  %v1334_v49 = vrot.slane %v1299_v44, 1  ;;  %v1470_v50 = vmul.f32 %v3559_v56, %v3631_v36  ;;  %v1471_v45 = vmul.f32 %v3559_v56, %v3633_v3 }
 0x1a1   : > { %1959 = vst.msk [vmem:[#allocation3 + $0x58] sm:$0x3] %vm1219_vm5, %v2922_v0  ;;  %2866 = vmatmul.mubr.msk.f32.vlgmr.msra.gmra.mxu1 %vm1217_vm4, %v1791_v41  ;;  %v1626_v32 = vadd.f32 %v1618_v24, %v1606_v57  ;;  %v1409_v63 = vrot.slane %v1374_v62, 2  ;;  %v1546_v52 = vmul.f32 %v3562_v59, %v3631_v36  ;;  %v1752_v1 = vsel %vm669_vm3, %v1750_v38, %v1751_v4 }
 0x1a2   : > { %v1335_v58 = vsel %vm592_vm2, %v1333_v35, %v1334_v49  ;;  %v1410_v43 = vrot.slane %v1375_v23, 2  ;;  %v1547_v51 = vmul.f32 %v3562_v59, %v3633_v3  ;;  %v1505_v6 = vrot.slane %v1470_v50, 1 }
 0x1a3   : > { %v1702_v5 = vadd.f32 %v1676_v16, %v1626_v32  ;;  %v1359_v37 = vadd.f32 %v1335_v58, %v1275_v61  ;;  %v1506_v9 = vrot.slane %v1471_v45, 1  ;;  %v1581_v11 = vrot.slane %v1546_v52, 2 }
 0x1a4   : > { %v1411_v10 = vsel %vm669_vm3, %v1409_v63, %v1410_v43  ;;  %v1582_v13 = vrot.slane %v1547_v51, 2  ;;  %v1642_v17 = vmul.f32 %v3518_v2, %v3689_v40  ;;  %v1447_v26 = vmul.f32 %v3556_v30, %v3631_v36 }
 0x1a5   : > { %v2860_v19 = vpop.f32.mrf.mxu1  ;;  %v1778_v24 = vadd.f32 %v1752_v1, %v1702_v5  ;;  %v1435_v25 = vadd.f32 %v1411_v10, %v1359_v37  ;;  %v1643_v27 = vmul.f32 %v3518_v2, %v3691_v55  ;;  %v1619_v22 = vmul.f32 %v3579_v7, %v3689_v40 }
 0x1a6   : > { %v1202_v28 = vadd.f32 %v2860_v19, %v3538_v20  ;;  %v1677_v29 = vrot.slane %v1642_v17, 1  ;;  %v1718_v14 = vmul.f32 %v3521_v34, %v3689_v40  ;;  %v1719_v4 = vmul.f32 %v3521_v34, %v3691_v55 }
 0x1a7   : > { %v1196_v21 = vpop.f32.mrf.mxu1  ;;  %v1792_v16 = vadd.f32 %v3597_v39, %v1778_v24  ;;  %v1455_v38 = vadd.f32 %v1447_v26, %v1435_v25  ;;  %v1678_v53 = vrot.slane %v1643_v27, 1  ;;  %v1507_v41 = vsel %vm592_vm2, %v1505_v6, %v1506_v9 }
 0x1a8   : > { %v1212_v46 = vmax.f32 %v1202_v28, 0.0  ;;  %v1197_v44 = vadd.f32 %v3538_v20, %v1196_v21  ;;  %v1583_v57 = vsel %vm669_vm3, %v1581_v11, %v1582_v13  ;;  %v1753_v62 = vrot.slane %v1718_v14, 2 }
 0x1a9   : > { %2868 = vmatprep.mubr.msk.f32.mxu1 %vm1217_vm4, %v1792_v16  ;;  %v1531_v61 = vadd.f32 %v1507_v41, %v1455_v38  ;;  %v1754_v35 = vrot.slane %v1719_v4, 2  ;;  %v1300_v49 = vmul.f32 %v3483_v48, %v3631_v36  ;;  %v1301_v50 = vmul.f32 %v3483_v48, %v3633_v3 }
 0x1aa   : > { %1247 = vst.msk [vmem:[#allocation3 + $0x81] sm:$0xff] %vm1217_vm4, %v1212_v46  ;;  %v1211_v23 = vmax.f32 %v1197_v44, 0.0  ;;  %v1376_v20 = vmul.f32 %v3486_v60, %v3631_v36  ;;  %v1377_v32 = vmul.f32 %v3486_v60, %v3633_v3  ;;  %v1679_v45 = vsel %vm592_vm2, %v1677_v29, %v1678_v53 }
 0x1ab   : > { %v1607_v63 = vadd.f32 %v1583_v57, %v1531_v61  ;;  %v1276_v52 = vmul.f32 %v3495_v8, %v3631_v36  ;;  %v1336_v1 = vrot.slane %v1300_v49, 1  ;;  %v1337_v58 = vrot.slane %v1301_v50, 1 }
 0x1ac   : > { %1246 = vst.msk [vmem:[#allocation3 + $0x71] sm:$0xff] %vm1217_vm4, %v1211_v23  ;;  %v1412_v43 = vrot.slane %v1376_v20, 2  ;;  %v1413_v51 = vrot.slane %v1377_v32, 2  ;;  %v1472_v5 = vmul.f32 %v3559_v56, %v3689_v40  ;;  %v1473_v6 = vmul.f32 %v3559_v56, %v3691_v55 }
 0x1ad   : > { %v1627_v37 = vadd.f32 %v1619_v22, %v1607_v63  ;;  %v1548_v3 = vmul.f32 %v3562_v59, %v3689_v40  ;;  %v1549_v9 = vmul.f32 %v3562_v59, %v3691_v55  ;;  %v1755_v36 = vsel %vm669_vm3, %v1753_v62, %v1754_v35 }
 0x1ae   : > { %v1338_v10 = vsel %vm592_vm2, %v1336_v1, %v1337_v58  ;;  %v1414_v11 = vsel %vm669_vm3, %v1412_v43, %v1413_v51  ;;  %v1508_v13 = vrot.slane %v1472_v5, 1  ;;  %v1509_v24 = vrot.slane %v1473_v6, 1 }
 0x1af   : > { %v1703_v17 = vadd.f32 %v1679_v45, %v1627_v37  ;;  %v1360_v19 = vadd.f32 %v1338_v10, %v1276_v52  ;;  %v1584_v25 = vrot.slane %v1548_v3, 2  ;;  %v1585_v26 = vrot.slane %v1549_v9, 2 }
 0x1b0   : > { %v1644_v27 = vmul.f32 %v3518_v2, %v3675_v31  ;;  %v1645_v28 = vmul.f32 %v3518_v2, %v3677_v54  ;;  %v1720_v22 = vmul.f32 %v3521_v34, %v3675_v31  ;;  %v1448_v38 = vmul.f32 %v3556_v30, %v3689_v40 }
 0x1b1   : > { %v3761_v29 = vld [vmem:[#allocation3 + $0x80] sm:$0xff]  ;;  %v3763_v14 = vld [vmem:[#allocation3 + $0x88] sm:$0x3]  ;;  %v1779_v21 = vadd.f32 %v1755_v36, %v1703_v17  ;;  %v1436_v16 = vadd.f32 %v1414_v11, %v1360_v19  ;;  %v1721_v53 = vmul.f32 %v3521_v34, %v3677_v54  ;;  %v1510_v4 = vsel %vm592_vm2, %v1508_v13, %v1509_v24 }
 0x1b2   : > { %1964 = vst.msk [vmem:[#allocation3 + $0x80] sm:$0xff] %vm1217_vm4, %v2922_v0  ;;  %v1620_v46 = vmul.f32 %v3579_v7, %v3675_v31  ;;  %v1680_v44 = vrot.slane %v1644_v27, 1  ;;  %v1681_v41 = vrot.slane %v1645_v28, 1  ;;  %v1586_v49 = vsel %vm669_vm3, %v1584_v25, %v1585_v26 }
 0x1b3   : > { %1965 = vst.msk [vmem:[#allocation3 + $0x88] sm:$0x3] %vm1219_vm5, %v2922_v0  ;;  %v3776_v57 = vld [vmem:[#allocation3 + $0x70] sm:$0xff]  ;;  %v3778_v61 = vld [vmem:[#allocation3 + $0x78] sm:$0x3]  ;;  %v1793_v62 = vadd.f32 %v3597_v39, %v1779_v21  ;;  %v1456_v35 = vadd.f32 %v1448_v38, %v1436_v16  ;;  %v1756_v23 = vrot.slane %v1720_v22, 2  ;;  %v1302_v20 = vmul.f32 %v3483_v48, %v3689_v40 }
 0x1b4   : > { %1962 = vst.msk [vmem:[#allocation3 + $0x70] sm:$0xff] %vm1217_vm4, %v2922_v0  ;;  %v1757_v50 = vrot.slane %v1721_v53, 2  ;;  %v1303_v32 = vmul.f32 %v3483_v48, %v3691_v55  ;;  %v1378_v63 = vmul.f32 %v3486_v60, %v3689_v40  ;;  %v1682_v52 = vsel %vm592_vm2, %v1680_v44, %v1681_v41 }
 0x1b5   : > { %1963 = vst.msk [vmem:[#allocation3 + $0x78] sm:$0x3] %vm1219_vm5, %v2922_v0  ;;  %2869 = vmatmul.mubr.msk.f32.gmra.mxu1 %vm1217_vm4, %v1793_v62  ;;  %v1532_v45 = vadd.f32 %v1510_v4, %v1456_v35  ;;  %v1277_v1 = vmul.f32 %v3495_v8, %v3689_v40  ;;  %v1379_v0 = vmul.f32 %v3486_v60, %v3691_v55  ;;  %v1339_v58 = vrot.slane %v1302_v20, 1 }
 0x1b6   : > { %v1340_v43 = vrot.slane %v1303_v32, 1  ;;  %v1415_v51 = vrot.slane %v1378_v63, 2  ;;  %v1474_v5 = vmul.f32 %v3559_v56, %v3675_v31  ;;  %v1475_v3 = vmul.f32 %v3559_v56, %v3677_v54 }
 0x1b7   : > { %v1608_v37 = vadd.f32 %v1586_v49, %v1532_v45  ;;  %v1416_v6 = vrot.slane %v1379_v0, 2  ;;  %v1550_v9 = vmul.f32 %v3562_v59, %v3675_v31  ;;  %v1758_v36 = vsel %vm669_vm3, %v1756_v23, %v1757_v50 }
 0x1b8   : > { %v1341_v40 = vsel %vm592_vm2, %v1339_v58, %v1340_v43  ;;  %v1511_v10 = vrot.slane %v1474_v5, 1  ;;  %v1551_v55 = vmul.f32 %v3562_v59, %v3677_v54  ;;  %v1512_v19 = vrot.slane %v1475_v3, 1 }
 0x1b9   : > { %v1628_v11 = vadd.f32 %v1620_v46, %v1608_v37  ;;  %v1361_v13 = vadd.f32 %v1341_v40, %v1277_v1  ;;  %v1417_v17 = vsel %vm669_vm3, %v1415_v51, %v1416_v6  ;;  %v1587_v24 = vrot.slane %v1550_v9, 2 }
 0x1ba   : > { %v1588_v25 = vrot.slane %v1551_v55, 2  ;;  %v1646_v26 = vmul.f32 %v3518_v2, %v3776_v57  ;;  %v1647_v27 = vmul.f32 %v3518_v2, %v3778_v61  ;;  %v1449_v21 = vmul.f32 %v3556_v30, %v3675_v31 }
 0x1bb   : > { %v1704_v28 = vadd.f32 %v1682_v52, %v1628_v11  ;;  %v1437_v22 = vadd.f32 %v1417_v17, %v1361_v13  ;;  %v1722_v16 = vmul.f32 %v3521_v34, %v3776_v57  ;;  %v1621_v38 = vmul.f32 %v3579_v7, %v3776_v57 }
 0x1bc   : > { %v1683_v53 = vrot.slane %v1646_v26, 1  ;;  %v1684_v4 = vrot.slane %v1647_v27, 1  ;;  %v1723_v46 = vmul.f32 %v3521_v34, %v3778_v61  ;;  %v1513_v62 = vsel %vm592_vm2, %v1511_v10, %v1512_v19 }
 0x1bd   : > { %v1780_v44 = vadd.f32 %v1758_v36, %v1704_v28  ;;  %v1457_v41 = vadd.f32 %v1449_v21, %v1437_v22  ;;  %v1589_v35 = vsel %vm669_vm3, %v1587_v24, %v1588_v25  ;;  %v1759_v49 = vrot.slane %v1722_v16, 2 }
 0x1be   : > { %v1278_v23 = vmul.f32 %v3495_v8, %v3675_v31  ;;  %v1304_v50 = vmul.f32 %v3483_v48, %v3675_v31  ;;  %v1305_v20 = vmul.f32 %v3483_v48, %v3677_v54  ;;  %v1380_v45 = vmul.f32 %v3486_v60, %v3675_v31 }
 0x1bf   : > { %v1794_v32 = vadd.f32 %v3597_v39, %v1780_v44  ;;  %v1533_v63 = vadd.f32 %v1513_v62, %v1457_v41  ;;  %v1381_v52 = vmul.f32 %v3486_v60, %v3677_v54  ;;  %v1685_v1 = vsel %vm592_vm2, %v1683_v53, %v1684_v4 }
 0x1c0   : > { %v1760_v0 = vrot.slane %v1723_v46, 2  ;;  %v1342_v58 = vrot.slane %v1304_v50, 1  ;;  %v1343_v43 = vrot.slane %v1305_v20, 1  ;;  %v1418_v5 = vrot.slane %v1380_v45, 2 }
 0x1c1   : > { %2871 = vmatprep.mubr.msk.f32.mxu1 %vm1217_vm4, %v1794_v32  ;;  %v1609_v51 = vadd.f32 %v1589_v35, %v1533_v63  ;;  %v1419_v37 = vrot.slane %v1381_v52, 2  ;;  %v1476_v6 = vmul.f32 %v3559_v56, %v3776_v57  ;;  %v1477_v31 = vmul.f32 %v3559_v56, %v3778_v61 }
 0x1c2   : > { %v1344_v3 = vsel %vm592_vm2, %v1342_v58, %v1343_v43  ;;  %v1552_v54 = vmul.f32 %v3562_v59, %v3776_v57  ;;  %v1553_v9 = vmul.f32 %v3562_v59, %v3778_v61  ;;  %v1450_v10 = vmul.f32 %v3556_v30, %v3776_v57 }
 0x1c3   : > { %v1629_v36 = vadd.f32 %v1621_v38, %v1609_v51  ;;  %v1362_v40 = vadd.f32 %v1344_v3, %v1278_v23  ;;  %v1514_v55 = vrot.slane %v1476_v6, 1  ;;  %v1420_v11 = vsel %vm669_vm3, %v1418_v5, %v1419_v37 }
 0x1c4   : > { %v1515_v13 = vrot.slane %v1477_v31, 1  ;;  %v1590_v17 = vrot.slane %v1552_v54, 2  ;;  %v1591_v19 = vrot.slane %v1553_v9, 2  ;;  %v1648_v26 = vmul.f32 %v3518_v2, %v3761_v29 }
 0x1c5   : > { %v1705_v24 = vadd.f32 %v1685_v1, %v1629_v36  ;;  %v1438_v25 = vadd.f32 %v1420_v11, %v1362_v40  ;;  %v1649_v27 = vmul.f32 %v3518_v2, %v3763_v14  ;;  %v1761_v28 = vsel %vm669_vm3, %v1759_v49, %v1760_v0 }
 0x1c6   : > { %v1516_v22 = vsel %vm592_vm2, %v1514_v55, %v1515_v13  ;;  %v1724_v21 = vmul.f32 %v3521_v34, %v3761_v29  ;;  %v1725_v53 = vmul.f32 %v3521_v34, %v3763_v14  ;;  %v1592_v4 = vsel %vm669_vm3, %v1590_v17, %v1591_v19 }
 0x1c7   : > { %v1781_v16 = vadd.f32 %v1761_v28, %v1705_v24  ;;  %v1458_v38 = vadd.f32 %v1450_v10, %v1438_v25  ;;  %v1622_v46 = vmul.f32 %v3579_v7, %v3761_v29  ;;  %v1686_v44 = vrot.slane %v1648_v26, 1  ;;  %v2527_v25 = vld [vmem:[%s4270_s11 + $0x8] sm:$0xff]  ;;  %v3912_v26 = vld [vmem:[%s4267_s8] ss:$0 sm:$0xff] }
 0x1c8   : > { %v1306_v2 = vmul.f32 %v3483_v48, %v3776_v57  ;;  %v1687_v35 = vrot.slane %v1649_v27, 1  ;;  %v1307_v49 = vmul.f32 %v3483_v48, %v3778_v61  ;;  %v1762_v23 = vrot.slane %v1724_v21, 2  ;;  %2877 = vmatprep.subr.mxu0 %v2527_v25 }
 0x1c9   : > { %v1795_v41 = vadd.f32 %v3597_v39, %v1781_v16  ;;  %v1534_v62 = vadd.f32 %v1516_v22, %v1458_v38  ;;  %v1382_v34 = vmul.f32 %v3486_v60, %v3776_v57  ;;  %v1383_v20 = vmul.f32 %v3486_v60, %v3778_v61  ;;  %2878 = vmatpush3.msra.mxu0 %v2527_v25 }
 0x1ca   : > { %v1345_v50 = vrot.slane %v1306_v2, 1  ;;  %v1763_v63 = vrot.slane %v1725_v53, 2  ;;  %v1346_v45 = vrot.slane %v1307_v49, 1  ;;  %v1478_v52 = vmul.f32 %v3559_v56, %v3761_v29 }
 0x1cb   : > { %2872 = vmatmul.mubr.msk.f32.gmra.mxu1 %vm1217_vm4, %v1795_v41  ;;  %v1610_v32 = vadd.f32 %v1592_v4, %v1534_v62  ;;  %v1279_v1 = vmul.f32 %v3495_v8, %v3776_v57  ;;  %v1421_v48 = vrot.slane %v1382_v34, 2  ;;  %v1422_v0 = vrot.slane %v1383_v20, 2 }
 0x1cc   : > { %v1479_v58 = vmul.f32 %v3559_v56, %v3763_v14  ;;  %v1347_v51 = vsel %vm592_vm2, %v1345_v50, %v1346_v45  ;;  %v1554_v60 = vmul.f32 %v3562_v59, %v3761_v29  ;;  %v1555_v61 = vmul.f32 %v3562_v59, %v3763_v14 }
 0x1cd   : > { %v1630_v43 = vadd.f32 %v1622_v46, %v1610_v32  ;;  %v1688_v5 = vsel %vm592_vm2, %v1686_v44, %v1687_v35  ;;  %v1363_v37 = vadd.f32 %v1347_v51, %v1279_v1  ;;  %v1423_v8 = vsel %vm669_vm3, %v1421_v48, %v1422_v0  ;;  %v1945_v32 = vld [vmem:[%s4268_s9 + $0x4] sm:$0x7] }
 0x1ce   : > { %v1517_v57 = vrot.slane %v1478_v52, 1  ;;  %v1518_v3 = vrot.slane %v1479_v58, 1  ;;  %v1764_v31 = vsel %vm669_vm3, %v1762_v23, %v1763_v63  ;;  %v1451_v54 = vmul.f32 %v3556_v30, %v3761_v29  ;;  %v1946_v23 = vld [vmem:[%s4268_s9 + $0x8] sm:$0x7] }
 0x1cf   : > { %v1706_v6 = vadd.f32 %v1688_v5, %v1630_v43  ;;  %v1439_v56 = vadd.f32 %v1423_v8, %v1363_v37  ;;  %v1593_v36 = vrot.slane %v1554_v60, 2  ;;  %v1594_v40 = vrot.slane %v1555_v61, 2 }
 0x1d0   : > { %v1519_v14 = vsel %vm592_vm2, %v1517_v57, %v1518_v3  ;;  %v1623_v11 = vmul.f32 %v3579_v7, %v3511_v33  ;;  %v2526_v33 = vld [vmem:[%s4270_s11] sm:$0xff]  ;;  %v3937_v45 = vrot.slane %v1946_v23, %v3070_v12  ;;  %v3941_v1 = vrot.slane %v1946_v23, %v3080_v18 }
 0x1d1   : > { %v1782_v9 = vadd.f32 %v1764_v31, %v1706_v6  ;;  %v1459_v10 = vadd.f32 %v1451_v54, %v1439_v56  ;;  %v1595_v13 = vsel %vm669_vm3, %v1593_v36, %v1594_v40  ;;  %2879 = vmatprep.subr.mxu0 %v2526_v33  ;;  %v1976_v7 = vld [vmem:[#allocation3] sm:$0xff]  ;;  %v3944_v48 = vrot.slane %v1946_v23, %v3078_v15 }
 0x1d2   : > { %2880 = vmatpush3.msra.mxu0 %v2526_v33  ;;  %v3951_v43 = vrot.slane %v1945_v32, %v3070_v12  ;;  %v3954_v60 = vrot.slane %v1945_v32, %v3080_v18  ;;  %v3957_v61 = vrot.slane %v1945_v32, %v3078_v15 }
 0x1d3   : > { %v1796_v59 = vadd.f32 %v3597_v39, %v1782_v9  ;;  %v1535_v55 = vadd.f32 %v1519_v14, %v1459_v10 }
 0x1d5   : > { %2874 = vmatprep.mubr.msk.f32.mxu1 %vm1217_vm4, %v1796_v59  ;;  %v1611_v17 = vadd.f32 %v1595_v13, %v1535_v55 }
 0x1d7   : > { %v1631_v19 = vadd.f32 %v1623_v11, %v1611_v17 }
 0x1d9   : > { %v1707_v30 = vadd.f32 %v3530_v42, %v1631_v19  ;;  %v1944_v42 = vld [vmem:[%s4268_s9] sm:$0x7] }
 0x1da   : > { %v3917_v22 = vrot.slane %v1944_v42, %v3078_v15  ;;  %v3921_v38 = vrot.slane %v1944_v42, %v3080_v18 }
 0x1db   : > { %v1783_v29 = vadd.f32 %v3533_v47, %v1707_v30  ;;  %v3907_v47 = vrot.slane %v1944_v42, %v3070_v12 }
 0x1dc   : > { %v2096_v44 = vmul.f32 %v3917_v22, %v1976_v7  ;;  %v2000_v49 = vmul.f32 %v3921_v38, %v1976_v7 }
 0x1dd   : > { %v1797_v24 = vadd.f32 %v3597_v39, %v1783_v29  ;;  %v1977_v39 = vld [vmem:[#allocation3 + $0x8] sm:$0x3]  ;;  %v2020_v27 = vmul.f32 %v3907_v47, %v1976_v7 }
 0x1de   : > { %v2021_v28 = vmul.f32 %v3907_v47, %v1977_v39  ;;  %v2097_v2 = vmul.f32 %v3917_v22, %v1977_v39  ;;  %v2128_v34 = vrot.slane %v2096_v44, 2 }
 0x1df   : > { %2875 = vmatmul.mubr.msk.f32.gmra.mxu1 %vm1217_vm4, %v1797_v24  ;;  %v2052_v4 = vrot.slane %v2020_v27, 1 }
 0x1e0   : > { %v2053_v46 = vrot.slane %v2021_v28, 1  ;;  %v2129_v20 = vrot.slane %v2097_v2, 2 }
 0x1e2   : > { %v2054_v50 = vsel %vm592_vm2, %v2052_v4, %v2053_v46  ;;  %v2130_v52 = vsel %vm669_vm3, %v2128_v34, %v2129_v20 }
 0x1e3   : > { %v2084_v63 = vadd.f32 %v2054_v50, %v2000_v49 }
 0x1e5   : > { %v2160_v51 = vadd.f32 %v2130_v52, %v2084_v63 }
 0x261   : > { %v2867_v21 = vpop.f32.mrf.mxu1 }
 0x262   : > { %v1903_v16 = vadd.f32 %v2867_v21, %v3912_v26 }
 0x263   : > { %v1897_v53 = vpop.f32.mrf.mxu1 }
 0x264   : > { %v1937_v41 = vmax.f32 %v1903_v16, 0.0  ;;  %v1898_v62 = vadd.f32 %v3912_v26, %v1897_v53 }
 0x266   : > { %1969 = vst.msk [vmem:[#allocation3 + $0x21] sm:$0xff] %vm1217_vm4, %v1937_v41  ;;  %v1936_v35 = vmax.f32 %v1898_v62, 0.0 }
 0x268   : > { %1968 = vst.msk [vmem:[#allocation3 + $0x11] sm:$0xff] %vm1217_vm4, %v1936_v35 }
 0x26d   : > { %v3946_v0 = vld [vmem:[#allocation3 + $0x20] sm:$0xff]  ;;  %v3948_v58 = vld [vmem:[#allocation3 + $0x28] sm:$0x3] }
 0x26e   : > { %v2364_v5 = vmul.f32 %v3937_v45, %v3946_v0  ;;  %v2344_v8 = vmul.f32 %v3941_v1, %v3946_v0  ;;  %v2365_v57 = vmul.f32 %v3937_v45, %v3948_v58  ;;  %v2440_v12 = vmul.f32 %v3944_v48, %v3946_v0 }
 0x26f   : > { %v1978_v37 = vld [vmem:[#allocation3 + $0x10] sm:$0xff]  ;;  %v1979_v6 = vld [vmem:[#allocation3 + $0x18] sm:$0x3]  ;;  %v2441_v18 = vmul.f32 %v3944_v48, %v3948_v58  ;;  %v2194_v40 = vmul.f32 %v3951_v43, %v3946_v0  ;;  %v2195_v55 = vmul.f32 %v3951_v43, %v3948_v58  ;;  %v2270_v41 = vmul.f32 %v3957_v61, %v3946_v0 }
 0x270   : > { %v2023_v15 = vmul.f32 %v3907_v47, %v1979_v6  ;;  %v2099_v3 = vmul.f32 %v3917_v22, %v1979_v6  ;;  %v2172_v31 = vmul.f32 %v3954_v60, %v1978_v37  ;;  %v2192_v56 = vmul.f32 %v3951_v43, %v1978_v37 }
 0x271   : > { %v2193_v54 = vmul.f32 %v3951_v43, %v1979_v6  ;;  %v2268_v9 = vmul.f32 %v3957_v61, %v1978_v37  ;;  %v2269_v36 = vmul.f32 %v3957_v61, %v1979_v6  ;;  %v2396_v14 = vrot.slane %v2364_v5, 1 }
 0x272   : > { %v2180_v10 = vadd.f32 %v2172_v31, %v2160_v51  ;;  %v2224_v59 = vrot.slane %v2192_v56, 1  ;;  %v2056_v11 = vrot.slane %v2023_v15, 1  ;;  %v2132_v30 = vrot.slane %v2099_v3, 2  ;;  %v4011_v31 = vld [vmem:[%s4269_s10] ss:$0 sm:$0xff] }
 0x273   : > { %v2225_v13 = vrot.slane %v2193_v54, 1  ;;  %v2300_v17 = vrot.slane %v2268_v9, 2  ;;  %v2301_v19 = vrot.slane %v2269_v36, 2  ;;  %v2397_v29 = vrot.slane %v2365_v57, 1 }
 0x274   : > { %v2472_v24 = vrot.slane %v2440_v12, 2  ;;  %v2022_v25 = vmul.f32 %v3907_v47, %v1978_v37  ;;  %v2473_v7 = vrot.slane %v2441_v18, 2  ;;  %v2001_v39 = vmul.f32 %v3921_v38, %v1978_v37 }
 0x275   : > { %v2870_v33 = vpop.f32.mrf.mxu1  ;;  %v2226_v42 = vsel %vm592_vm2, %v2224_v59, %v2225_v13  ;;  %v2098_v27 = vmul.f32 %v3917_v22, %v1978_v37  ;;  %v2302_v16 = vsel %vm669_vm3, %v2300_v17, %v2301_v19  ;;  %v2227_v44 = vrot.slane %v2194_v40, 1 }
 0x276   : > { %v1913_v28 = vadd.f32 %v2870_v33, %v3912_v26  ;;  %v2256_v21 = vadd.f32 %v2226_v42, %v2180_v10  ;;  %v2055_v53 = vrot.slane %v2022_v25, 1  ;;  %v2228_v2 = vrot.slane %v2195_v55, 1 }
 0x277   : > { %v1907_v4 = vpop.f32.mrf.mxu1  ;;  %v2131_v46 = vrot.slane %v2098_v27, 2  ;;  %v2398_v50 = vsel %vm592_vm2, %v2396_v14, %v2397_v29  ;;  %v2173_v20 = vmul.f32 %v3954_v60, %v3946_v0  ;;  %v2271_v32 = vmul.f32 %v3957_v61, %v3948_v58 }
 0x278   : > { %v1939_v62 = vmax.f32 %v1913_v28, 0.0  ;;  %v1908_v35 = vadd.f32 %v3912_v26, %v1907_v4  ;;  %v2332_v49 = vadd.f32 %v2302_v16, %v2256_v21  ;;  %v2057_v23 = vsel %vm592_vm2, %v2055_v53, %v2056_v11 }
 0x279   : > { %v2085_v34 = vadd.f32 %v2057_v23, %v2001_v39  ;;  %v2474_v51 = vsel %vm669_vm3, %v2472_v24, %v2473_v7  ;;  %v2133_v5 = vsel %vm669_vm3, %v2131_v46, %v2132_v30  ;;  %v2229_v6 = vsel %vm592_vm2, %v2227_v44, %v2228_v2 }
 0x27a   : > { %1971 = vst.msk [vmem:[#allocation3 + $0x41] sm:$0xff] %vm1217_vm4, %v1939_v62  ;;  %v1938_v63 = vmax.f32 %v1908_v35, 0.0  ;;  %v2352_v52 = vadd.f32 %v2344_v8, %v2332_v49  ;;  %v2024_v57 = vmul.f32 %v3907_v47, %v3946_v0  ;;  %v2025_v12 = vmul.f32 %v3907_v47, %v3948_v58 }
 0x27b   : > { %v2161_v37 = vadd.f32 %v2133_v5, %v2085_v34  ;;  %v2303_v15 = vrot.slane %v2270_v41, 2  ;;  %v2100_v8 = vmul.f32 %v3917_v22, %v3946_v0  ;;  %v2101_v3 = vmul.f32 %v3917_v22, %v3948_v58 }
 0x27c   : > { %1970 = vst.msk [vmem:[#allocation3 + $0x31] sm:$0xff] %vm1217_vm4, %v1938_v63  ;;  %v2428_v18 = vadd.f32 %v2398_v50, %v2352_v52  ;;  %v2304_v54 = vrot.slane %v2271_v32, 2  ;;  %v2058_v9 = vrot.slane %v2024_v57, 1  ;;  %v2059_v36 = vrot.slane %v2025_v12, 1 }
 0x27d   : > { %v2181_v56 = vadd.f32 %v2173_v20, %v2161_v37  ;;  %v2002_v10 = vmul.f32 %v3921_v38, %v3946_v0  ;;  %v2134_v59 = vrot.slane %v2100_v8, 2  ;;  %v2135_v14 = vrot.slane %v2101_v3, 2 }
 0x27e   : > { %v2504_v40 = vadd.f32 %v2474_v51, %v2428_v18  ;;  %v2060_v11 = vsel %vm592_vm2, %v2058_v9, %v2059_v36  ;;  %v2305_v17 = vsel %vm669_vm3, %v2303_v15, %v2304_v54 }
 0x27f   : > { %v2257_v55 = vadd.f32 %v2229_v6, %v2181_v56  ;;  %v2086_v13 = vadd.f32 %v2060_v11, %v2002_v10  ;;  %v2136_v29 = vsel %vm669_vm3, %v2134_v59, %v2135_v14 }
 0x280   : > { %v2518_v58 = vadd.f32 %v4011_v31, %v2504_v40 }
 0x281   : > { %v4018_v19 = vld [vmem:[#allocation3 + $0x40] sm:$0xff]  ;;  %v4020_v30 = vld [vmem:[#allocation3 + $0x48] sm:$0x3]  ;;  %v2333_v24 = vadd.f32 %v2305_v17, %v2257_v55  ;;  %v2162_v0 = vadd.f32 %v2136_v29, %v2086_v13 }
 0x282   : > { %2881 = vmatprep.mubr.msk.f32.mxu0 %vm1217_vm4, %v2518_v58  ;;  %v2346_v25 = vmul.f32 %v3941_v1, %v4018_v19  ;;  %v2368_v7 = vmul.f32 %v3937_v45, %v4018_v19  ;;  %v2369_v39 = vmul.f32 %v3937_v45, %v4020_v30  ;;  %v2444_v27 = vmul.f32 %v3944_v48, %v4018_v19 }
 0x283   : > { %v1982_v33 = vld [vmem:[#allocation3 + $0x30] sm:$0xff]  ;;  %v1983_v42 = vld [vmem:[#allocation3 + $0x38] sm:$0x3]  ;;  %v2445_v28 = vmul.f32 %v3944_v48, %v4020_v30  ;;  %v2175_v5 = vmul.f32 %v3954_v60, %v4018_v19  ;;  %v2198_v12 = vmul.f32 %v3951_v43, %v4018_v19 }
 0x284   : > { %v2345_v21 = vmul.f32 %v3941_v1, %v1982_v33  ;;  %v2366_v16 = vmul.f32 %v3937_v45, %v1982_v33  ;;  %v2367_v53 = vmul.f32 %v3937_v45, %v1983_v42  ;;  %v2442_v4 = vmul.f32 %v3944_v48, %v1982_v33 }
 0x285   : > { %v2443_v46 = vmul.f32 %v3944_v48, %v1983_v42  ;;  %v2174_v44 = vmul.f32 %v3954_v60, %v1982_v33  ;;  %v2196_v2 = vmul.f32 %v3951_v43, %v1982_v33  ;;  %v2197_v41 = vmul.f32 %v3951_v43, %v1983_v42 }
 0x286   : > { %v2353_v62 = vadd.f32 %v2345_v21, %v2333_v24  ;;  %v2399_v35 = vrot.slane %v2366_v16, 1  ;;  %v2400_v49 = vrot.slane %v2367_v53, 1  ;;  %v2475_v23 = vrot.slane %v2442_v4, 2 }
 0x287   : > { %v2476_v50 = vrot.slane %v2443_v46, 2  ;;  %v2182_v34 = vadd.f32 %v2174_v44, %v2162_v0  ;;  %v2230_v20 = vrot.slane %v2196_v2, 1  ;;  %v2231_v32 = vrot.slane %v2197_v41, 1 }
 0x288   : > { %v2401_v63 = vsel %vm592_vm2, %v2399_v35, %v2400_v49  ;;  %v2272_v52 = vmul.f32 %v3957_v61, %v1982_v33  ;;  %v2273_v51 = vmul.f32 %v3957_v61, %v1983_v42  ;;  %v2402_v57 = vrot.slane %v2368_v7, 1 }
 0x289   : > { %v2429_v37 = vadd.f32 %v2401_v63, %v2353_v62  ;;  %v2232_v6 = vsel %vm592_vm2, %v2230_v20, %v2231_v32  ;;  %v2477_v18 = vsel %vm669_vm3, %v2475_v23, %v2476_v50  ;;  %v2403_v9 = vrot.slane %v2369_v39, 1 }
 0x28a   : > { %v2258_v15 = vadd.f32 %v2232_v6, %v2182_v34  ;;  %v2306_v8 = vrot.slane %v2272_v52, 2  ;;  %v2307_v3 = vrot.slane %v2273_v51, 2  ;;  %v2478_v36 = vrot.slane %v2444_v27, 2 }
 0x28b   : > { %v2873_v56 = vpop.f32.mrf.mxu1  ;;  %v2505_v54 = vadd.f32 %v2477_v18, %v2429_v37  ;;  %v2479_v40 = vrot.slane %v2445_v28, 2  ;;  %v2026_v14 = vmul.f32 %v3907_v47, %v1982_v33  ;;  %v2027_v55 = vmul.f32 %v3907_v47, %v1983_v42 }
 0x28c   : > { %v1923_v10 = vadd.f32 %v2873_v56, %v3912_v26  ;;  %v2308_v59 = vsel %vm669_vm3, %v2306_v8, %v2307_v3  ;;  %v2003_v17 = vmul.f32 %v3921_v38, %v1982_v33  ;;  %v2102_v29 = vmul.f32 %v3917_v22, %v1982_v33 }
 0x28d   : > { %v1917_v11 = vpop.f32.mrf.mxu1  ;;  %v2519_v58 = vadd.f32 %v4011_v31, %v2505_v54  ;;  %v2334_v13 = vadd.f32 %v2308_v59, %v2258_v15  ;;  %v2061_v7 = vrot.slane %v2026_v14, 1  ;;  %v2062_v39 = vrot.slane %v2027_v55, 1 }
 0x28e   : > { %v1941_v24 = vmax.f32 %v1923_v10, 0.0  ;;  %v1918_v0 = vadd.f32 %v3912_v26, %v1917_v11  ;;  %v2103_v28 = vmul.f32 %v3917_v22, %v1983_v42  ;;  %v2137_v21 = vrot.slane %v2102_v29, 2 }
 0x28f   : > { %2882 = vmatmul.mubr.msk.f32.vlgmr.msra.gmra.mxu0 %vm1217_vm4, %v2519_v58  ;;  %v2354_v27 = vadd.f32 %v2346_v25, %v2334_v13  ;;  %v2199_v16 = vmul.f32 %v3951_v43, %v4020_v30  ;;  %v2404_v4 = vsel %vm592_vm2, %v2402_v57, %v2403_v9  ;;  %v2063_v33 = vsel %vm592_vm2, %v2061_v7, %v2062_v39 }
 0x290   : > { %1973 = vst.msk [vmem:[#allocation3 + $0x61] sm:$0xff] %vm1217_vm4, %v1941_v24  ;;  %v1940_v53 = vmax.f32 %v1918_v0, 0.0  ;;  %v2274_v46 = vmul.f32 %v3957_v61, %v4018_v19  ;;  %v2480_v2 = vsel %vm669_vm3, %v2478_v36, %v2479_v40  ;;  %v2087_v25 = vadd.f32 %v2063_v33, %v2003_v17 }
 0x291   : > { %v2430_v44 = vadd.f32 %v2404_v4, %v2354_v27  ;;  %v2138_v41 = vrot.slane %v2103_v28, 2  ;;  %v2233_v42 = vrot.slane %v2198_v12, 1  ;;  %v2234_v62 = vrot.slane %v2199_v16, 1 }
 0x292   : > { %1972 = vst.msk [vmem:[#allocation3 + $0x51] sm:$0xff] %vm1217_vm4, %v1940_v53  ;;  %v2275_v35 = vmul.f32 %v3957_v61, %v4020_v30  ;;  %v2028_v49 = vmul.f32 %v3907_v47, %v4018_v19  ;;  %v2309_v34 = vrot.slane %v2274_v46, 2  ;;  %v2029_v20 = vmul.f32 %v3907_v47, %v4020_v30 }
 0x293   : > { %v2506_v23 = vadd.f32 %v2480_v2, %v2430_v44  ;;  %v2139_v50 = vsel %vm669_vm3, %v2137_v21, %v2138_v41  ;;  %v2104_v51 = vmul.f32 %v3917_v22, %v4018_v19  ;;  %v2105_v57 = vmul.f32 %v3917_v22, %v4020_v30 }
 0x294   : > { %v2163_v32 = vadd.f32 %v2139_v50, %v2087_v25  ;;  %v2310_v63 = vrot.slane %v2275_v35, 2  ;;  %v2064_v52 = vrot.slane %v2028_v49, 1  ;;  %v2065_v6 = vrot.slane %v2029_v20, 1 }
 0x295   : > { %v2520_v37 = vadd.f32 %v4011_v31, %v2506_v23  ;;  %v2004_v18 = vmul.f32 %v3921_v38, %v4018_v19  ;;  %v2140_v15 = vrot.slane %v2104_v51, 2  ;;  %v2235_v8 = vsel %vm592_vm2, %v2233_v42, %v2234_v62 }
 0x296   : > { %v2183_v12 = vadd.f32 %v2175_v5, %v2163_v32  ;;  %v2066_v54 = vsel %vm592_vm2, %v2064_v52, %v2065_v6  ;;  %v2141_v9 = vrot.slane %v2105_v57, 2  ;;  %v2311_v40 = vsel %vm669_vm3, %v2309_v34, %v2310_v63 }
 0x297   : > { %2884 = vmatprep.mubr.msk.f32.mxu0 %vm1217_vm4, %v2520_v37  ;;  %v4086_v3 = vld [vmem:[#allocation3 + $0x60] sm:$0xff]  ;;  %v4088_v56 = vld [vmem:[#allocation3 + $0x68] sm:$0x3]  ;;  %v2088_v30 = vadd.f32 %v2066_v54, %v2004_v18 }
 0x298   : > { %v2259_v36 = vadd.f32 %v2235_v8, %v2183_v12  ;;  %v2372_v5 = vmul.f32 %v3937_v45, %v4086_v3  ;;  %v2142_v59 = vsel %vm669_vm3, %v2140_v15, %v2141_v9  ;;  %v2373_v14 = vmul.f32 %v3937_v45, %v4088_v56 }
 0x299   : > { %v1986_v19 = vld [vmem:[#allocation3 + $0x50] sm:$0xff]  ;;  %v1987_v10 = vld [vmem:[#allocation3 + $0x58] sm:$0x3]  ;;  %v2448_v55 = vmul.f32 %v3944_v48, %v4086_v3  ;;  %v2449_v11 = vmul.f32 %v3944_v48, %v4088_v56  ;;  %v2164_v7 = vadd.f32 %v2142_v59, %v2088_v30  ;;  %v2348_v51 = vmul.f32 %v3941_v1, %v4086_v3 }
 0x29a   : > { %v2335_v58 = vadd.f32 %v2311_v40, %v2259_v36  ;;  %v2347_v13 = vmul.f32 %v3941_v1, %v1986_v19  ;;  %v2370_v17 = vmul.f32 %v3937_v45, %v1986_v19  ;;  %v2371_v29 = vmul.f32 %v3937_v45, %v1987_v10 }
 0x29b   : > { %v2446_v24 = vmul.f32 %v3944_v48, %v1986_v19  ;;  %v2447_v0 = vmul.f32 %v3944_v48, %v1987_v10  ;;  %v2176_v39 = vmul.f32 %v3954_v60, %v1986_v19  ;;  %v2200_v16 = vmul.f32 %v3951_v43, %v1986_v19 }
 0x29c   : > { %v2355_v27 = vadd.f32 %v2347_v13, %v2335_v58  ;;  %v2405_v28 = vrot.slane %v2370_v17, 1  ;;  %v2406_v21 = vrot.slane %v2371_v29, 1  ;;  %v2201_v46 = vmul.f32 %v3951_v43, %v1987_v10 }
 0x29d   : > { %v2481_v53 = vrot.slane %v2446_v24, 2  ;;  %v2482_v4 = vrot.slane %v2447_v0, 2  ;;  %v2184_v33 = vadd.f32 %v2176_v39, %v2164_v7  ;;  %v2236_v2 = vrot.slane %v2200_v16, 1 }
 0x29e   : > { %v2407_v44 = vsel %vm592_vm2, %v2405_v28, %v2406_v21  ;;  %v2276_v25 = vmul.f32 %v3957_v61, %v1986_v19  ;;  %v2277_v41 = vmul.f32 %v3957_v61, %v1987_v10  ;;  %v2237_v62 = vrot.slane %v2201_v46, 1 }
 0x29f   : > { %v2431_v42 = vadd.f32 %v2407_v44, %v2355_v27  ;;  %v2408_v35 = vrot.slane %v2372_v5, 1  ;;  %v2876_v49 = vpop.f32.mrf.mxu1  ;;  %v2483_v23 = vsel %vm669_vm3, %v2481_v53, %v2482_v4  ;;  %v2409_v20 = vrot.slane %v2373_v14, 1 }
 0x2a0   : > { %v2312_v50 = vrot.slane %v2276_v25, 2  ;;  %v2313_v34 = vrot.slane %v2277_v41, 2  ;;  %v1933_v32 = vadd.f32 %v2876_v49, %v3912_v26  ;;  %v2238_v52 = vsel %vm592_vm2, %v2236_v2, %v2237_v62 }
 0x2a1   : > { %v2507_v63 = vadd.f32 %v2483_v23, %v2431_v42  ;;  %v1927_v37 = vpop.f32.mrf.mxu1  ;;  %v2260_v6 = vadd.f32 %v2238_v52, %v2184_v33  ;;  %v2484_v12 = vrot.slane %v2448_v55, 2  ;;  %v2485_v18 = vrot.slane %v2449_v11, 2 }
 0x2a2   : > { %v2314_v57 = vsel %vm669_vm3, %v2312_v50, %v2313_v34  ;;  %v1943_v15 = vmax.f32 %v1933_v32, 0.0  ;;  %v1928_v8 = vadd.f32 %v3912_v26, %v1927_v37  ;;  %v2410_v9 = vsel %vm592_vm2, %v2408_v35, %v2409_v20 }
 0x2a3   : > { %v2521_v54 = vadd.f32 %v4011_v31, %v2507_v63  ;;  %v2336_v36 = vadd.f32 %v2314_v57, %v2260_v6  ;;  %v2030_v40 = vmul.f32 %v3907_v47, %v1986_v19  ;;  %v2031_v30 = vmul.f32 %v3907_v47, %v1987_v10 }
 0x2a4   : > { %v2106_v5 = vmul.f32 %v3917_v22, %v1986_v19  ;;  %1975 = vst.msk [vmem:[#allocation3 + $0x81] sm:$0xff] %vm1217_vm4, %v1943_v15  ;;  %v1942_v59 = vmax.f32 %v1928_v8, 0.0  ;;  %v2005_v14 = vmul.f32 %v3921_v38, %v1986_v19  ;;  %v2107_v26 = vmul.f32 %v3917_v22, %v1987_v10 }
 0x2a5   : > { %2885 = vmatmul.mubr.msk.f32.gmra.mxu0 %vm1217_vm4, %v2521_v54  ;;  %v2202_v55 = vmul.f32 %v3951_v43, %v4086_v3  ;;  %v2356_v11 = vadd.f32 %v2348_v51, %v2336_v36  ;;  %v2067_v58 = vrot.slane %v2030_v40, 1  ;;  %v2068_v13 = vrot.slane %v2031_v30, 1 }
 0x2a6   : > { %v2143_v17 = vrot.slane %v2106_v5, 2  ;;  %1974 = vst.msk [vmem:[#allocation3 + $0x71] sm:$0xff] %vm1217_vm4, %v1942_v59  ;;  %v2486_v29 = vsel %vm669_vm3, %v2484_v12, %v2485_v18  ;;  %v2144_v24 = vrot.slane %v2107_v26, 2  ;;  %v2203_v0 = vmul.f32 %v3951_v43, %v4088_v56 }
 0x2a7   : > { %v2278_v19 = vmul.f32 %v3957_v61, %v4086_v3  ;;  %v2432_v7 = vadd.f32 %v2410_v9, %v2356_v11  ;;  %v2069_v10 = vsel %vm592_vm2, %v2067_v58, %v2068_v13  ;;  %v2239_v39 = vrot.slane %v2202_v55, 1 }
 0x2a8   : > { %v2279_v27 = vmul.f32 %v3957_v61, %v4088_v56  ;;  %v2089_v28 = vadd.f32 %v2069_v10, %v2005_v14  ;;  %v2145_v21 = vsel %vm669_vm3, %v2143_v17, %v2144_v24  ;;  %v2240_v16 = vrot.slane %v2203_v0, 1 }
 0x2a9   : > { %v2315_v53 = vrot.slane %v2278_v19, 2  ;;  %v2508_v4 = vadd.f32 %v2486_v29, %v2432_v7  ;;  %v2032_v46 = vmul.f32 %v3907_v47, %v4086_v3  ;;  %v2033_v44 = vmul.f32 %v3907_v47, %v4088_v56 }
 0x2aa   : > { %v2316_v33 = vrot.slane %v2279_v27, 2  ;;  %v2165_v2 = vadd.f32 %v2145_v21, %v2089_v28  ;;  %v2177_v25 = vmul.f32 %v3954_v60, %v4086_v3  ;;  %v2108_v41 = vmul.f32 %v3917_v22, %v4086_v3 }
 0x2ab   : > { %v2109_v42 = vmul.f32 %v3917_v22, %v4088_v56  ;;  %v2522_v62 = vadd.f32 %v4011_v31, %v2508_v4  ;;  %v4151_v35 = vld [vmem:[#allocation3 + $0x80] sm:$0xff]  ;;  %v2070_v49 = vrot.slane %v2032_v46, 1  ;;  %v2071_v23 = vrot.slane %v2033_v44, 1  ;;  %v1993_v54 = vld [vmem:[#allocation3 + $0x88] sm:$0x3] }
 0x2ac   : > { %v2185_v50 = vadd.f32 %v2177_v25, %v2165_v2  ;;  %v2006_v34 = vmul.f32 %v3921_v38, %v4086_v3  ;;  %v2146_v20 = vrot.slane %v2108_v41, 2  ;;  %v2241_v51 = vsel %vm592_vm2, %v2239_v39, %v2240_v16 }
 0x2ad   : > { %v2147_v32 = vrot.slane %v2109_v42, 2  ;;  %2887 = vmatprep.mubr.msk.f32.mxu0 %vm1217_vm4, %v2522_v62  ;;  %v1990_v63 = vld [vmem:[#allocation3 + $0x70] sm:$0xff]  ;;  %v1991_v52 = vld [vmem:[#allocation3 + $0x78] sm:$0x3]  ;;  %v2317_v56 = vsel %vm669_vm3, %v2315_v53, %v2316_v33  ;;  %v2072_v37 = vsel %vm592_vm2, %v2070_v49, %v2071_v23  ;;  %v2376_v6 = vmul.f32 %v3937_v45, %v4151_v35 }
 0x2ae   : > { %v2261_v57 = vadd.f32 %v2241_v51, %v2185_v50  ;;  %v2349_v12 = vmul.f32 %v3941_v1, %v1990_v63  ;;  %v2374_v3 = vmul.f32 %v3937_v45, %v1990_v63  ;;  %v2375_v18 = vmul.f32 %v3937_v45, %v1991_v52 }
 0x2af   : > { %v2450_v15 = vmul.f32 %v3944_v48, %v1990_v63  ;;  %v2451_v8 = vmul.f32 %v3944_v48, %v1991_v52  ;;  %v2090_v9 = vadd.f32 %v2072_v37, %v2006_v34  ;;  %v2148_v36 = vsel %vm669_vm3, %v2146_v20, %v2147_v32  ;;  %v1995_v37 = vld [vmem:[#allocation3 + $0x98] sm:$0x3] }
 0x2b0   : > { %v2337_v40 = vadd.f32 %v2317_v56, %v2261_v57  ;;  %v2411_v30 = vrot.slane %v2374_v3, 1  ;;  %v2412_v5 = vrot.slane %v2375_v18, 1  ;;  %v2178_v59 = vmul.f32 %v3954_v60, %v1990_v63  ;;  %v1994_v56 = vld [vmem:[#allocation3 + $0x90] sm:$0xff] }
 0x2b1   : > { %v2487_v14 = vrot.slane %v2450_v15, 2  ;;  %v2488_v26 = vrot.slane %v2451_v8, 2  ;;  %v2166_v55 = vadd.f32 %v2148_v36, %v2090_v9  ;;  %v2204_v11 = vmul.f32 %v3951_v43, %v1990_v63 }
 0x2b2   : > { %v2357_v58 = vadd.f32 %v2349_v12, %v2337_v40  ;;  %v2205_v13 = vmul.f32 %v3951_v43, %v1991_v52  ;;  %v2280_v17 = vmul.f32 %v3957_v61, %v1990_v63  ;;  %v2377_v29 = vmul.f32 %v3937_v45, %v1993_v54 }
 0x2b3   : > { %v2413_v24 = vsel %vm592_vm2, %v2411_v30, %v2412_v5  ;;  %v2186_v0 = vadd.f32 %v2178_v59, %v2166_v55  ;;  %v2242_v19 = vrot.slane %v2204_v11, 1  ;;  %v2281_v7 = vmul.f32 %v3957_v61, %v1991_v52 }
 0x2b4   : > { %v2433_v10 = vadd.f32 %v2413_v24, %v2357_v58  ;;  %v2243_v39 = vrot.slane %v2205_v13, 1  ;;  %v2318_v27 = vrot.slane %v2280_v17, 2  ;;  %v2489_v28 = vsel %vm669_vm3, %v2487_v14, %v2488_v26 }
 0x2b5   : > { %v2319_v21 = vrot.slane %v2281_v7, 2  ;;  %v2452_v16 = vmul.f32 %v3944_v48, %v4151_v35  ;;  %v2453_v53 = vmul.f32 %v3944_v48, %v1993_v54  ;;  %v2350_v46 = vmul.f32 %v3941_v1, %v4151_v35 }
 0x2b6   : > { %v2509_v4 = vadd.f32 %v2489_v28, %v2433_v10  ;;  %v2244_v33 = vsel %vm592_vm2, %v2242_v19, %v2243_v39  ;;  %v2034_v44 = vmul.f32 %v3907_v47, %v1990_v63  ;;  %v2414_v41 = vrot.slane %v2376_v6, 1 }
 0x2b7   : > { %v2262_v2 = vadd.f32 %v2244_v33, %v2186_v0  ;;  %v2320_v25 = vsel %vm669_vm3, %v2318_v27, %v2319_v21  ;;  %v2415_v42 = vrot.slane %v2377_v29, 1  ;;  %v2035_v49 = vmul.f32 %v3907_v47, %v1991_v52 }
 0x2b8   : > { %v2523_v62 = vadd.f32 %v4011_v31, %v2509_v4  ;;  %v2073_v23 = vrot.slane %v2034_v44, 1  ;;  %v2110_v50 = vmul.f32 %v3917_v22, %v1990_v63  ;;  %v2490_v20 = vrot.slane %v2452_v16, 2 }
 0x2b9   : > { %v2338_v34 = vadd.f32 %v2320_v25, %v2262_v2  ;;  %v2491_v32 = vrot.slane %v2453_v53, 2  ;;  %v2111_v51 = vmul.f32 %v3917_v22, %v1991_v52  ;;  %v2074_v57 = vrot.slane %v2035_v49, 1 }
 0x2ba   : > { %2888 = vmatmul.mubr.msk.f32.gmra.mxu0 %vm1217_vm4, %v2523_v62  ;;  %v2149_v12 = vrot.slane %v2110_v50, 2  ;;  %v2206_v6 = vmul.f32 %v3951_v43, %v4151_v35  ;;  %v2207_v3 = vmul.f32 %v3951_v43, %v1993_v54  ;;  %v2007_v18 = vmul.f32 %v3921_v38, %v1990_v63 }
 0x2bb   : > { %v2358_v47 = vadd.f32 %v2350_v46, %v2338_v34  ;;  %v2150_v15 = vrot.slane %v2111_v51, 2  ;;  %v2416_v8 = vsel %vm592_vm2, %v2414_v41, %v2415_v42  ;;  %v2075_v9 = vsel %vm592_vm2, %v2073_v23, %v2074_v57 }
 0x2bc   : > { %v2282_v22 = vmul.f32 %v3957_v61, %v4151_v35  ;;  %v2283_v52 = vmul.f32 %v3957_v61, %v1993_v54  ;;  %v2091_v40 = vadd.f32 %v2075_v9, %v2007_v18  ;;  %v2378_v30 = vmul.f32 %v3937_v45, %v1994_v56  ;;  %v2906_v18 = vld [vmem:[%s3057_s14 + $0x8] sm:$0xff]  ;;  %v2907_v9 = vld [vmem:[%s3057_s14] sm:$0xff] }
 0x2bd   : > { %v2434_v36 = vadd.f32 %v2416_v8, %v2358_v47  ;;  %v2379_v5 = vmul.f32 %v3937_v45, %v1995_v37  ;;  %v2492_v43 = vsel %vm669_vm3, %v2490_v20, %v2491_v32  ;;  %v2151_v38 = vsel %vm669_vm3, %v2149_v12, %v2150_v15 }
 0x2be   : > { %v2245_v63 = vrot.slane %v2206_v6, 1  ;;  %v2246_v59 = vrot.slane %v2207_v3, 1  ;;  %v2167_v26 = vadd.f32 %v2151_v38, %v2091_v40  ;;  %v2179_v55 = vmul.f32 %v3954_v60, %v4151_v35 }
 0x2bf   : > { %v2510_v14 = vadd.f32 %v2492_v43, %v2434_v36  ;;  %v2321_v11 = vrot.slane %v2282_v22, 2  ;;  %v2322_v58 = vrot.slane %v2283_v52, 2  ;;  %v2454_v61 = vmul.f32 %v3944_v48, %v1994_v56  ;;  %v2908_v36 = vld [vmem:[%s3057_s14 + $0x18] sm:$0xff] }
 0x2c0   : > { %v2455_v54 = vmul.f32 %v3944_v48, %v1995_v37  ;;  %v2187_v45 = vadd.f32 %v2179_v55, %v2167_v26  ;;  %v2247_v17 = vsel %vm592_vm2, %v2245_v63, %v2246_v59  ;;  %v2417_v29 = vrot.slane %v2378_v30, 1  ;;  %v2910_v63 = vld [vmem:[%s3057_s14 + $0x28] sm:$0xff]  ;;  %v2911_v26 = vld [vmem:[%s3057_s14 + $0x20] sm:$0xff] }
 0x2c1   : > { %v2524_v13 = vadd.f32 %v4011_v31, %v2510_v14  ;;  %v2418_v24 = vrot.slane %v2379_v5, 1  ;;  %v2351_v19 = vmul.f32 %v3941_v1, %v1994_v56  ;;  %v2323_v60 = vsel %vm669_vm3, %v2321_v11, %v2322_v58  ;;  %v2805_v1 = vld [vmem:[%s4271_s12] ss:$0 sm:$0xff]  ;;  %v2909_v5 = vld [vmem:[%s3057_s14 + $0x10] sm:$0xff]  ;;  %v2912_v58 = vld [vmem:[%s3057_s14 + $0x38] sm:$0xff] }
 0x2c2   : > { %v2263_v0 = vadd.f32 %v2247_v17, %v2187_v45  ;;  %v2493_v35 = vrot.slane %v2454_v61, 2  ;;  %v2494_v7 = vrot.slane %v2455_v54, 2 }
 0x2c3   : > { %2890 = vmatprep.mubr.msk.f32.mxu0 %vm1217_vm4, %v2524_v13  ;;  %v2419_v39 = vsel %vm592_vm2, %v2417_v29, %v2418_v24  ;;  %v2913_v13 = vld [vmem:[%s3057_s14 + $0x30] sm:$0xff] }
 0x2c4   : > { %v2339_v10 = vadd.f32 %v2323_v60, %v2263_v0  ;;  %v2495_v27 = vsel %vm669_vm3, %v2493_v35, %v2494_v7 }
 0x2c6   : > { %v2359_v48 = vadd.f32 %v2351_v19, %v2339_v10 }
 0x2c8   : > { %v2435_v28 = vadd.f32 %v2419_v39, %v2359_v48 }
 0x2ca   : > { %v2511_v21 = vadd.f32 %v2495_v27, %v2435_v28 }
 0x2cc   : > { %v2525_v16 = vadd.f32 %v4011_v31, %v2511_v21 }
 0x2ce   : > { %2891 = vmatmul.mubr.msk.f32.gmra.mxu0 %vm1217_vm4, %v2525_v16 }
 0x34f   : > { %v2883_v53 = vpop.f32.mrf.mxu0 }
 0x350   : > { %v2631_v4 = vadd.f32 %v2883_v53, %v2805_v1 }
 0x351   : > { %v2625_v33 = vpop.f32.mrf.mxu0 }
 0x352   : > { %v2665_v46 = vmax.f32 %v2631_v4, 0.0  ;;  %v2626_v44 = vadd.f32 %v2805_v1, %v2625_v33 }
 0x354   : > { %v2664_v2 = vmax.f32 %v2626_v44, 0.0  ;;  %2682 = vrot.lane.b32.xlu1 %v2665_v46, %s2924_s17 }
 0x356   : > { %2680 = vrot.lane.b32.xlu0 %v2664_v2, %s2924_s17 }
 0x365   : > { %v2886_v25 = vpop.f32.mrf.mxu0 }
 0x366   : > { %v2641_v41 = vadd.f32 %v2886_v25, %v2805_v1 }
 0x367   : > { %v2635_v42 = vpop.f32.mrf.mxu0 }
 0x368   : > { %v2667_v62 = vmax.f32 %v2641_v41, 0.0  ;;  %v2636_v31 = vadd.f32 %v2805_v1, %v2635_v42 }
 0x36a   : > { %v2666_v49 = vmax.f32 %v2636_v31, 0.0  ;;  %2686 = vrot.lane.b32.xlu1 %v2667_v62, %s2924_s17 }
 0x36c   : > { %2684 = vrot.lane.b32.xlu0 %v2666_v49, %s2924_s17 }
 0x37a   : > { %v2889_v23 = vpop.f32.mrf.mxu0 }
 0x37b   : > { %v2651_v50 = vadd.f32 %v2889_v23, %v2805_v1 }
 0x37c   : > { %v2645_v34 = vpop.f32.mrf.mxu0 }
 0x37d   : > { %v2669_v20 = vmax.f32 %v2651_v50, 0.0  ;;  %v2646_v32 = vadd.f32 %v2805_v1, %v2645_v34 }
 0x37f   : > { %v2668_v51 = vmax.f32 %v2646_v32, 0.0  ;;  %2690 = vrot.lane.b32.xlu1 %v2669_v20, %s2924_s17 }
 0x381   : > { %2688 = vrot.lane.b32.xlu0 %v2668_v51, %s2924_s17 }
 0x38e   : > { %v2892_v56 = vpop.f32.mrf.mxu0 }
 0x38f   : > { %v2661_v37 = vadd.f32 %v2892_v56, %v2805_v1 }
 0x390   : > { %v2655_v57 = vpop.f32.mrf.mxu0 }
 0x391   : > { %v2671_v12 = vmax.f32 %v2661_v37, 0.0  ;;  %v2656_v6 = vadd.f32 %v2805_v1, %v2655_v57 }
 0x393   : > { %v2670_v3 = vmax.f32 %v2656_v6, 0.0  ;;  %2694 = vrot.lane.b32.xlu1 %v2671_v12, %s2924_s17 }
 0x395   : > { %2692 = vrot.lane.b32.xlu0 %v2670_v3, %s2924_s17 }
 0x3c6   : > { %v2683_v47 = vpop.permute.xlu1 %2682 }
 0x3c7   : > { %v2705_v15 = vsel %vm453_vm0, %v2906_v18, %v2683_v47 }
 0x3c8   : > { %2713 = vst.msk [vmem:[%s4222_s20 + $0x8] sm:$0xff] %vm1217_vm4, %v2705_v15  ;;  %v2681_v8 = vpop.permute.xlu0 %2680 }
 0x3c9   : > { %v2704_v22 = vsel %vm453_vm0, %v2907_v9, %v2681_v8 }
 0x3ca   : > { %2712 = vst.msk [vmem:[%s4222_s20] sm:$0xff] %vm1217_vm4, %v2704_v22 }
 0x3dc   : > { %v2687_v52 = vpop.permute.xlu1 %2686 }
 0x3dd   : > { %v2707_v40 = vsel %vm453_vm0, %v2908_v36, %v2687_v52 }
 0x3de   : > { %2715 = vst.msk [vmem:[%s4222_s20 + $0x18] sm:$0xff] %vm1217_vm4, %v2707_v40  ;;  %v2685_v30 = vpop.permute.xlu0 %2684 }
 0x3df   : > { %v2706_v43 = vsel %vm453_vm0, %v2909_v5, %v2685_v30 }
 0x3e0   : > { %2714 = vst.msk [vmem:[%s4222_s20 + $0x10] sm:$0xff] %vm1217_vm4, %v2706_v43 }
 0x3f1   : > { %v2691_v38 = vpop.permute.xlu1 %2690 }
 0x3f2   : > { %v2709_v59 = vsel %vm453_vm0, %v2910_v63, %v2691_v38 }
 0x3f3   : > { %2717 = vst.msk [vmem:[%s4222_s20 + $0x28] sm:$0xff] %vm1217_vm4, %v2709_v59  ;;  %v2689_v14 = vpop.permute.xlu0 %2688 }
 0x3f4   : > { %v2708_v55 = vsel %vm453_vm0, %v2911_v26, %v2689_v14 }
 0x3f5   : > { %2716 = vst.msk [vmem:[%s4222_s20 + $0x20] sm:$0xff] %vm1217_vm4, %v2708_v55 }
 0x405   : > { %v2695_v11 = vpop.permute.xlu1 %2694 }
 0x406   : > { %v2711_v61 = vsel %vm453_vm0, %v2912_v58, %v2695_v11 }
 0x407   : > { %2719 = vst.msk [vmem:[%s4222_s20 + $0x38] sm:$0xff] %vm1217_vm4, %v2711_v61  ;;  %v2693_v54 = vpop.permute.xlu0 %2692 }
 0x408   : > { %v2710_v45 = vsel %vm453_vm0, %v2913_v13, %v2693_v54 }
 0x409   : > { %2718 = vst.msk [vmem:[%s4222_s20 + $0x30] sm:$0xff] %vm1217_vm4, %v2710_v45 }
 0x40a PF: > { %s23_s25 = sadd.s32 1, %s2920_s25  }
 0x40b   : > { %p20_p4 = scmp.ge.s32.totalorder %s23_s25, 4  }
 0x40d   :  { %22 = sbr.rel (!%p20_p4) target bundleno = 1 (0x1), region = 104 }

</bundles_post_ra>
